<compile_context>
chip_gen: v7x
topology: tpu7x:2x2x1
jax: 0.10.0
libtpu: 0.0.40
codegen_flags: <defaults>
</compile_context>

<pallas_src>
import functools

import jax
import jax.numpy as jnp
from jax import lax
from jax.experimental import pallas as pl
from jax.experimental.pallas import tpu as pltpu

EPS = 1e-5


# --------------------------------------------------------------------------- #
# VMEM sizing helpers
# --------------------------------------------------------------------------- #
def _padded_bytes(shape, itemsize=4):
    """Approx VMEM footprint of one buffer padded to the (8, 128) vreg tiling."""
    shape = tuple(shape)
    if len(shape) < 2:
        shape = (1,) * (2 - len(shape)) + shape
    lead = 1
    for d in shape[:-2]:
        lead *= d
    sub = -(-shape[-2] // 8) * 8
    lane = -(-shape[-1] // 128) * 128
    return lead * sub * lane * itemsize


def _vmem_capacity_bytes():
    """Per-generation VMEM capacity (128 MiB on v5e/v6e, 64 MiB per-TC on v7x)."""
    try:
        cap = int(pltpu.get_tpu_info().vmem_capacity_bytes)
        if cap > 0:
            return cap
    except Exception:
        pass
    return 64 * 1024 * 1024  # conservative default (v7x per-TC)


def _vmem_usage_bytes(TH, *, Hp, Wp, C, Cout, W):
    """Rough per-grid-step VMEM bill for a TH-row tile: double-buffered pipeline
    blocks plus in-kernel im2col temporaries."""
    TS = TH * W
    img = _padded_bytes((1, Hp, Wp, C))        # whole zero-padded image block
    wgt = _padded_bytes((Cout, 9 * C))         # flattened taps
    outb = _padded_bytes((Cout, TS))           # conv/output slab
    halo = _padded_bytes((TH + 2, Wp, C))      # row tile + halo slice copy
    patch = _padded_bytes((TS, 9 * C))         # im2col patch
    return 2 * img + 2 * wgt + 2 * outb + halo + 3 * patch + (64 << 10)


def _pick_row_tile(H, W, usage_fn, budget_bytes):
    """LARGEST TH dividing H with lane-dense (TH*W) % 128 == 0 that fits the VMEM
    budget (bigger tiles -> fewer grid steps, wider unmasked stores, bigger MXU N)."""
    lane_dense = [th for th in range(1, H + 1)
                  if H % th == 0 and (th * W) % 128 == 0]
    if not lane_dense:
        # Block shape must equal the full array dims when TH*W isn't a multiple
        # of 128 (the (8,128) BlockSpec rule): fall back to one tile per image.
        return H
    fitting = [th for th in lane_dense if usage_fn(th) <= budget_bytes]
    return max(fitting) if fitting else min(lane_dense)


# --------------------------------------------------------------------------- #
# Kernels
# --------------------------------------------------------------------------- #
def _conv_tile(xp_ref, w_ref, *, TH, W, C, use_bf16):
    """3x3 conv of one TH-row tile as ONE fused MXU contraction (K = 9*C).

    xp_ref: (1, Hp, Wp, C)  whole zero-padded image (block constant across t)
    w_ref:  (Cout, 9*C)     taps flattened in (dy, dx, c) column order
    returns (Cout, TH*W) f32 -- spatial axis lane-dense, NCHW-flattened order.
    """
    t = pl.program_id(1)
    r0 = pl.multiple_of(t * TH, TH)

    # Row tile plus a 1-row halo on each side (input already zero padded).
    xh = xp_ref[0, pl.ds(r0, TH + 2), :, :]                  # (TH+2, Wp, C)

    # In-kernel im2col: 9 shifted taps concatenated on the channel (lane) axis.
    # TODO(synk): dx=1,2 taps start at unaligned sublane offsets (XLU rotates) and
    # the slices materialize VMEM copies; pltpu.roll-based shifts or a padded-C
    # layout would shave the vector ld/st + XLU traffic further.
    taps = []
    for dy in range(3):
        for dx in range(3):
            taps.append(xh[dy:dy + TH, dx:dx + W, :])         # (TH, W, C)
    patch = jnp.concatenate(taps, axis=2).reshape(TH * W, 9 * C)

    w = w_ref[...]
    if use_bf16:
        # Opt-in bf16 MXU operands with f32 accumulation (~1e-3 drift vs f32 ref).
        patch = patch.astype(jnp.bfloat16)
        w = w.astype(jnp.bfloat16)

    # (Cout, 9C) x (TH*W, 9C)^T -> (Cout, TH*W): lane-dense, no output transpose.
    return lax.dot_general(
        w, patch,
        dimension_numbers=(((1,), (1,)), ((), ())),
        preferred_element_type=jnp.float32)


def conv_stats_kernel(xp_ref, w_ref, psum_ref, psq_ref, *, TH, W, C, use_bf16):
    """Pass 1 (stats only): conv tile + per-image BN partial statistics
    accumulated in VMEM across the row-tile axis.

    psum_ref / psq_ref: (1, Cout, 1) -- same block for every t (accumulator)."""
    out_t = _conv_tile(xp_ref, w_ref, TH=TH, W=W, C=C, use_bf16=use_bf16)

    t = pl.program_id(1)

    @pl.when(t == 0)
    def _():
        psum_ref[...] = jnp.zeros_like(psum_ref)
        psq_ref[...] = jnp.zeros_like(psq_ref)

    psum_ref[0] += jnp.sum(out_t, axis=1, keepdims=True)
    psq_ref[0] += jnp.sum(out_t * out_t, axis=1, keepdims=True)


def conv_bn_relu_kernel(xp_ref, w_ref, scale_ref, bias_ref, o_ref,
                        *, TH, W, C, use_bf16):
    """Pass 2: recompute the conv tile and fuse y*scale + bias, ReLU.
    No f32 intermediate ever round-trips through HBM."""
    out_t = _conv_tile(xp_ref, w_ref, TH=TH, W=W, C=C, use_bf16=use_bf16)
    o_ref[0] = jnp.maximum(out_t * scale_ref[...] + bias_ref[...], 0.0)


# --------------------------------------------------------------------------- #
# Wrapper
# --------------------------------------------------------------------------- #
def conv3x3_forward(x_nchw, w_oihw, gamma, beta, *, use_bf16_mxu=False):
    """x_nchw: (N, C, H, W) f32, w_oihw: (Cout, C, 3, 3) f32, gamma/beta: (Cout,).
    Returns (N, Cout, H, W) f32 matching PyTorch conv3x3.forward (training BN)."""
    N, C, H, W = x_nchw.shape
    Cout = w_oihw.shape[0]
    Hp, Wp = H + 2, W + 2

    capacity = _vmem_capacity_bytes()
    budget = int(0.70 * capacity)                       # headroom for compiler scratch
    usage_fn = functools.partial(_vmem_usage_bytes, Hp=Hp, Wp=Wp, C=C, Cout=Cout, W=W)
    TH = _pick_row_tile(H, W, usage_fn, budget)
    HT = H // TH
    TS = TH * W
    vmem_limit = int(min(capacity,
                         max(budget, 2 * usage_fn(TH), 32 * 1024 * 1024)))

    # Glue (XLA): channels-last layout for the in-kernel im2col, zero pad=1.
    # TODO(synk): fold this transpose/pad into the kernel to save one HBM round
    # trip of the activation.
    x_nhwc = jnp.transpose(x_nchw, (0, 2, 3, 1)).astype(jnp.float32)
    x_pad = jnp.pad(x_nhwc, ((0, 0), (1, 1), (1, 1), (0, 0)))
    # (Cout, C, 3, 3) -> (Cout, 3, 3, C) -> (Cout, 9*C); matches patch column order.
    wmat = jnp.transpose(w_oihw, (0, 2, 3, 1)).reshape(Cout, 9 * C).astype(jnp.float32)

    grid = (N, HT)
    # n: parallel (megacore / 2-TC sharding on the batch axis); t: arbitrary
    # (pass-1 stats accumulate across t, and row tiles of one image stay on one
    # core so the resident padded image isn't duplicated across cores on v7x).
    cparams = pltpu.CompilerParams(
        dimension_semantics=("parallel", "arbitrary"),
        vmem_limit_bytes=vmem_limit)

    kern_kwargs = dict(TH=TH, W=W, C=C, use_bf16=use_bf16_mxu)

    # ---- Pass 1: per-image BN partial statistics (tiny outputs, no y slab) ----
    psum, psq = pl.pallas_call(
        functools.partial(conv_stats_kernel, **kern_kwargs),
        grid=grid,
        in_specs=[
            # Whole padded image per batch index (constant across t -> fetched once
            # per image). TODO(synk): switch to manual TH+2 halo-row DMA (P4) for
            # images too large to double-buffer on v7x's 64 MiB VMEM.
            pl.BlockSpec((1, Hp, Wp, C), lambda n, t: (n, 0, 0, 0)),
            pl.BlockSpec((Cout, 9 * C), lambda n, t: (0, 0)),
        ],
        out_specs=[
            pl.BlockSpec((1, Cout, 1), lambda n, t: (n, 0, 0)),
            pl.BlockSpec((1, Cout, 1), lambda n, t: (n, 0, 0)),
        ],
        out_shape=(
            jax.ShapeDtypeStruct((N, Cout, 1), jnp.float32),
            jax.ShapeDtypeStruct((N, Cout, 1), jnp.float32),
        ),
        compiler_params=cparams,
    )(x_pad, wmat)

    # ---- Finalize training-mode batch stats (tiny per-channel math) ----------
    # TODO(synk): E[x^2]-E[x]^2 can cancel catastrophically for large-mean
    # activations; a shifted / centered second pass would be more robust at scale.
    count = float(N * H * W)
    s = jnp.sum(psum[:, :, 0], axis=0)                   # (Cout,)
    sq = jnp.sum(psq[:, :, 0], axis=0)
    mean = s / count
    var = jnp.maximum(sq / count - mean * mean, 0.0)     # biased variance
    inv_std = lax.rsqrt(var + EPS)
    g = gamma.astype(jnp.float32)
    b = beta.astype(jnp.float32)
    scale = (g * inv_std).reshape(Cout, 1)
    bias = (b - mean * g * inv_std).reshape(Cout, 1)

    # ---- Pass 2: recompute conv tile, fused scale/bias/ReLU, lane-dense store --
    out_flat = pl.pallas_call(
        functools.partial(conv_bn_relu_kernel, **kern_kwargs),
        grid=grid,
        in_specs=[
            pl.BlockSpec((1, Hp, Wp, C), lambda n, t: (n, 0, 0, 0)),
            pl.BlockSpec((Cout, 9 * C), lambda n, t: (0, 0)),
            pl.BlockSpec((Cout, 1), lambda n, t: (0, 0)),
            pl.BlockSpec((Cout, 1), lambda n, t: (0, 0)),
        ],
        out_specs=pl.BlockSpec((1, Cout, TS), lambda n, t: (n, 0, t)),
        out_shape=jax.ShapeDtypeStruct((N, Cout, H * W), jnp.float32),
        compiler_params=cparams,
    )(x_pad, wmat, scale, bias)

    # NCHW result is a free metadata reshape of the lane-dense slab.
    return out_flat.reshape(N, Cout, H, W)


# --------------------------------------------------------------------------- #
# Pure-JAX reference mirroring PyTorch conv3x3 forward (training-mode BN)
# --------------------------------------------------------------------------- #
def reference_forward(x_nchw, w_oihw, gamma, beta):
    conv = lax.conv_general_dilated(
        x_nchw, w_oihw, window_strides=(1, 1), padding="SAME",
        dimension_numbers=("NCHW", "OIHW", "NCHW"))
    mean = conv.mean(axis=(0, 2, 3), keepdims=True)
    var = conv.var(axis=(0, 2, 3), keepdims=True)        # biased variance
    xn = (conv - mean) / jnp.sqrt(var + EPS)
    y = xn * gamma.reshape(1, -1, 1, 1) + beta.reshape(1, -1, 1, 1)
    return jnp.maximum(y, 0.0)


if __name__ == "__main__":
    key = jax.random.PRNGKey(0)
    kx, kw = jax.random.split(key)

    N, C, H, W = 2, 4, 16, 16
    Cout = 8

    x = jax.random.normal(kx, (N, C, H, W), dtype=jnp.float32)
    # Deterministic synthetic conv weight (no checkpoint).
    w = jax.random.normal(kw, (Cout, C, 3, 3), dtype=jnp.float32) * 0.1
    # BatchNorm2d default affine params: weight=1, bias=0.
    gamma = jnp.ones((Cout,), jnp.float32)
    beta = jnp.zeros((Cout,), jnp.float32)

    out = conv3x3_forward(x, w, gamma, beta)
    out = jax.block_until_ready(out)

    ref = reference_forward(x, w, gamma, beta)
    assert out.shape == (N, Cout, H, W)
    assert jnp.allclose(out, ref, atol=1e-4, rtol=1e-4), (
        f"max abs err {jnp.max(jnp.abs(out - ref))}")

    print("KERNEL_OK")
</pallas_src>

<mosaic_0001>
module attributes {stable_mosaic.version = 11 : i64} {
  func.func @conv_stats_kernel(%arg0: i32, %arg1: i32, %arg2: memref<1x18x18x4xf32, #tpu.memory_space<vmem>>, %arg3: memref<8x36xf32, #tpu.memory_space<vmem>>, %arg4: memref<1x8x1xf32, #tpu.memory_space<vmem>>, %arg5: memref<1x8x1xf32, #tpu.memory_space<vmem>>) attributes {dimension_semantics = [#tpu.dimension_semantics<parallel>, #tpu.dimension_semantics<arbitrary>], iteration_bounds = array<i64: 2, 1>, scalar_prefetch = 0 : i64, scratch_operands = 0 : i64, tpu.core_type = #tpu.core_type<tc>, window_params = [{transform_indices = @transform_0, window_bounds = array<i64: 1, 18, 18, 4>}, {pipeline_mode = #tpu.pipeline_mode<synchronous>, transform_indices = @transform_1, window_bounds = array<i64: 8, 36>}, {transform_indices = @transform_2, window_bounds = array<i64: 1, 8, 1>}, {transform_indices = @transform_3, window_bounds = array<i64: 1, 8, 1>}]} {
    %c16_i32 = arith.constant 16 : i32
    %0 = arith.muli %arg1, %c16_i32 : i32
    %1 = tpu.assume_multiple %0, 16 : i32
    %c0 = arith.constant 0 : index
    %2 = arith.index_cast %1 : i32 to index
    %c0_0 = arith.constant 0 : index
    %c0_1 = arith.constant 0 : index
    %3 = vector.load %arg2[%c0, %2, %c0_0, %c0_1] : memref<1x18x18x4xf32, #tpu.memory_space<vmem>>, vector<1x18x18x4xf32>
    %4 = vector.shape_cast %3 : vector<1x18x18x4xf32> to vector<18x18x4xf32>
    %5 = vector.extract_strided_slice %4 {offsets = [0, 0, 0], sizes = [16, 16, 4], strides = [1, 1, 1]} : vector<18x18x4xf32> to vector<16x16x4xf32>
    %6 = vector.extract_strided_slice %4 {offsets = [0, 1, 0], sizes = [16, 16, 4], strides = [1, 1, 1]} : vector<18x18x4xf32> to vector<16x16x4xf32>
    %7 = vector.extract_strided_slice %4 {offsets = [0, 2, 0], sizes = [16, 16, 4], strides = [1, 1, 1]} : vector<18x18x4xf32> to vector<16x16x4xf32>
    %8 = vector.extract_strided_slice %4 {offsets = [1, 0, 0], sizes = [16, 16, 4], strides = [1, 1, 1]} : vector<18x18x4xf32> to vector<16x16x4xf32>
    %9 = vector.extract_strided_slice %4 {offsets = [1, 1, 0], sizes = [16, 16, 4], strides = [1, 1, 1]} : vector<18x18x4xf32> to vector<16x16x4xf32>
    %10 = vector.extract_strided_slice %4 {offsets = [1, 2, 0], sizes = [16, 16, 4], strides = [1, 1, 1]} : vector<18x18x4xf32> to vector<16x16x4xf32>
    %11 = vector.extract_strided_slice %4 {offsets = [2, 0, 0], sizes = [16, 16, 4], strides = [1, 1, 1]} : vector<18x18x4xf32> to vector<16x16x4xf32>
    %12 = vector.extract_strided_slice %4 {offsets = [2, 1, 0], sizes = [16, 16, 4], strides = [1, 1, 1]} : vector<18x18x4xf32> to vector<16x16x4xf32>
    %13 = vector.extract_strided_slice %4 {offsets = [2, 2, 0], sizes = [16, 16, 4], strides = [1, 1, 1]} : vector<18x18x4xf32> to vector<16x16x4xf32>
    %14 = tpu.concatenate %5, %6, %7, %8, %9, %10, %11, %12, %13 in 2 : vector<16x16x4xf32>, vector<16x16x4xf32>, vector<16x16x4xf32>, vector<16x16x4xf32>, vector<16x16x4xf32>, vector<16x16x4xf32>, vector<16x16x4xf32>, vector<16x16x4xf32>, vector<16x16x4xf32> -> vector<16x16x36xf32>
    %15 = vector.shape_cast %14 : vector<16x16x36xf32> to vector<256x36xf32>
    %c0_2 = arith.constant 0 : index
    %c0_3 = arith.constant 0 : index
    %16 = vector.load %arg3[%c0_2, %c0_3] : memref<8x36xf32, #tpu.memory_space<vmem>>, vector<8x36xf32>
    %cst = arith.constant dense<0.000000e+00> : vector<8x256xf32>
    %17 = tpu.matmul %16, %15, %cst {dimension_numbers = #tpu.dot_dimension_numbers<[1], [1], [0], [0], [0, 0, 1, 0], [], []>} : vector<8x36xf32>, vector<256x36xf32>, vector<8x256xf32> -> vector<8x256xf32>
    %c0_i32 = arith.constant 0 : i32
    %18 = arith.cmpi eq, %arg1, %c0_i32 : i32
    %19 = arith.extui %18 : i1 to i32
    %c0_i32_4 = arith.constant 0 : i32
    %20 = arith.cmpi ne, %19, %c0_i32_4 : i32
    scf.if %20 {
      %cst_19 = arith.constant 0.000000e+00 : f32
      %38 = vector.broadcast %cst_19 : f32 to vector<1x8x1xf32>
      %c0_20 = arith.constant 0 : index
      %c0_21 = arith.constant 0 : index
      %c0_22 = arith.constant 0 : index
      %39 = vector.load %arg4[%c0_20, %c0_21, %c0_22] : memref<1x8x1xf32, #tpu.memory_space<vmem>>, vector<1x8x1xf32>
      tpu.vector_store %arg4[%c0_20, %c0_21, %c0_22], %38 {strides = array<i32>} : memref<1x8x1xf32, #tpu.memory_space<vmem>>, vector<1x8x1xf32>,
      %cst_23 = arith.constant 0.000000e+00 : f32
      %40 = vector.broadcast %cst_23 : f32 to vector<1x8x1xf32>
      %c0_24 = arith.constant 0 : index
      %c0_25 = arith.constant 0 : index
      %c0_26 = arith.constant 0 : index
      %41 = vector.load %arg5[%c0_24, %c0_25, %c0_26] : memref<1x8x1xf32, #tpu.memory_space<vmem>>, vector<1x8x1xf32>
      tpu.vector_store %arg5[%c0_24, %c0_25, %c0_26], %40 {strides = array<i32>} : memref<1x8x1xf32, #tpu.memory_space<vmem>>, vector<1x8x1xf32>,
    } else {
    }
    %c0_5 = arith.constant 0 : index
    %c0_6 = arith.constant 0 : index
    %c0_7 = arith.constant 0 : index
    %21 = vector.load %arg4[%c0_5, %c0_6, %c0_7] : memref<1x8x1xf32, #tpu.memory_space<vmem>>, vector<1x8x1xf32>
    %22 = vector.shape_cast %21 : vector<1x8x1xf32> to vector<8x1xf32>
    %cst_8 = arith.constant dense<0.000000e+00> : vector<8xf32>
    %23 = vector.multi_reduction <add>, %17, %cst_8 [1] : vector<8x256xf32> to vector<8xf32>
    %24 = vector.shape_cast %23 : vector<8xf32> to vector<8x1xf32>
    %25 = arith.addf %22, %24 : vector<8x1xf32>
    %c0_9 = arith.constant 0 : index
    %c0_10 = arith.constant 0 : index
    %c0_11 = arith.constant 0 : index
    %26 = vector.load %arg4[%c0_9, %c0_10, %c0_11] : memref<1x8x1xf32, #tpu.memory_space<vmem>>, vector<1x8x1xf32>
    %27 = vector.shape_cast %26 : vector<1x8x1xf32> to vector<8x1xf32>
    %28 = vector.shape_cast %25 : vector<8x1xf32> to vector<1x8x1xf32>
    tpu.vector_store %arg4[%c0_9, %c0_10, %c0_11], %28 {strides = array<i32>} : memref<1x8x1xf32, #tpu.memory_space<vmem>>, vector<1x8x1xf32>,
    %c0_12 = arith.constant 0 : index
    %c0_13 = arith.constant 0 : index
    %c0_14 = arith.constant 0 : index
    %29 = vector.load %arg5[%c0_12, %c0_13, %c0_14] : memref<1x8x1xf32, #tpu.memory_space<vmem>>, vector<1x8x1xf32>
    %30 = vector.shape_cast %29 : vector<1x8x1xf32> to vector<8x1xf32>
    %31 = arith.mulf %17, %17 : vector<8x256xf32>
    %cst_15 = arith.constant dense<0.000000e+00> : vector<8xf32>
    %32 = vector.multi_reduction <add>, %31, %cst_15 [1] : vector<8x256xf32> to vector<8xf32>
    %33 = vector.shape_cast %32 : vector<8xf32> to vector<8x1xf32>
    %34 = arith.addf %30, %33 : vector<8x1xf32>
    %c0_16 = arith.constant 0 : index
    %c0_17 = arith.constant 0 : index
    %c0_18 = arith.constant 0 : index
    %35 = vector.load %arg5[%c0_16, %c0_17, %c0_18] : memref<1x8x1xf32, #tpu.memory_space<vmem>>, vector<1x8x1xf32>
    %36 = vector.shape_cast %35 : vector<1x8x1xf32> to vector<8x1xf32>
    %37 = vector.shape_cast %34 : vector<8x1xf32> to vector<1x8x1xf32>
    tpu.vector_store %arg5[%c0_16, %c0_17, %c0_18], %37 {strides = array<i32>} : memref<1x8x1xf32, #tpu.memory_space<vmem>>, vector<1x8x1xf32>,
    return
  }
  func.func @transform_0(%arg0: i32, %arg1: i32) -> (i32, i32, i32, i32) {
    %c0_i32 = arith.constant 0 : i32
    %c0_i32_0 = arith.constant 0 : i32
    %c0_i32_1 = arith.constant 0 : i32
    %c0_i32_2 = arith.constant 0 : i32
    return %arg0, %c0_i32, %c0_i32_0, %c0_i32_1 : i32, i32, i32, i32
  }
  func.func @transform_1(%arg0: i32, %arg1: i32) -> (i32, i32) {
    %c0_i32 = arith.constant 0 : i32
    %c0_i32_0 = arith.constant 0 : i32
    %c0_i32_1 = arith.constant 0 : i32
    return %c0_i32, %c0_i32_0 : i32, i32
  }
  func.func @transform_2(%arg0: i32, %arg1: i32) -> (i32, i32, i32) {
    %c0_i32 = arith.constant 0 : i32
    %c0_i32_0 = arith.constant 0 : i32
    %c0_i32_1 = arith.constant 0 : i32
    return %arg0, %c0_i32, %c0_i32_0 : i32, i32, i32
  }
  func.func @transform_3(%arg0: i32, %arg1: i32) -> (i32, i32, i32) {
    %c0_i32 = arith.constant 0 : i32
    %c0_i32_0 = arith.constant 0 : i32
    %c0_i32_1 = arith.constant 0 : i32
    return %arg0, %c0_i32, %c0_i32_0 : i32, i32, i32
  }
}

</mosaic_0001>

<bundles_post_ra>
// kernel: tpu_custom_call.1
= control target key start
LH: loop header
LB: loop body
LE: loop exit
PB: predicated region body
PF: predicated region fallthrough
CT: control target
= control target key end

     0   :  { %s2687_s12 = smov 0   ;;  %s2689_s13 = smov 0   ;;  %s3896_s0 = inlined_call_operand.vmem [shape: f32[2,18,18,4], index: 0, kind: input, shape index: {}]   ;;  %s3897_s1 = inlined_call_operand.vmem [shape: f32[8,36], index: 1, kind: input, shape index: {}]   ;;  %s3898_s2 = inlined_call_operand.vmem [shape: f32[2,8,1], index: 2, kind: output, shape index: {0}]   ;;  %s3899_s3 = inlined_call_operand.vmem [shape: f32[2,8,1], index: 3, kind: output, shape index: {1}]  }
   0x1   :  { %s2691_s14 = smov 0  }
   0x2 LB: > { %s26_s15 = sadd.s32 1, %s2652_s13  ;;  %p1809_p0 = scmp.ge.s32.totalorder %s2656_s14, 1  ;;  %s2656_s14 = sphi %s2691_s14, %s14_s14   ;;  %s2652_s13 = sphi %s2689_s13, %s3976_s13   ;;  %s2648_s12 = sphi %s2687_s12, %s3975_s12  }
   0x3   : > { %p28_p1 = scmp.ge.s32.totalorder %s26_s15, 2  ;;  %p152_p2 = scmp.lt.s32.totalorder %s2656_s14, 3 }
   0x5   : > { %s3978_s15 = smov (%p28_p1, %s26_s15), 0  ;;  %p153_p3 = pnand %p1809_p0, %p152_p2 }
   0x7   : > { %156 = sbr.rel (%p153_p3) target bundleno = 770 (0x302), region = 28 }
   0xe   : > { %p179_p4 = scmp.lt.s32.totalorder %s2648_s12, 1  ;;  %vm297_vm0 = vcmask 1046528   ;;  %s2658_s20 = smov 4   ;;  %vm474_vm1 = vcmask 1045504   ;;  %vm1253_vm2 = vcmask 31744   ;;  %vm1286_vm3 = vcmask 64512  }
   0xf   : > { %s2659_s21 = smov 8   ;;  %s2660_s22 = smov 12   ;;  %vm1319_vm4 = vcmask 97280   ;;  %vm1352_vm5 = vcmask 130048   ;;  %vm1385_vm6 = vcmask 162816   ;;  %vm1418_vm7 = vcmask 195584  }
  0x10   : > { %s3980_s12 = smov (!%p179_p4, %s2648_s12), 1  ;;  %s2661_s23 = smov 16   ;;  %vm1451_vm8 = vcmask 228352   ;;  %vm1484_vm9 = vcmask 261120   ;;  %vm1518_vm10 = vcmask 293888   ;;  %vm1693_vm12 = vcmask 7168  }
  0x11   : > { %s1930_s16 = smul.u32 432, %s3980_s12  ;;  %s2662_s24 = smov 20   ;;  %vm3369_vm11 = vmpackc.low %vm1518_vm10, %vm1518_vm10 }
  0x12   : > { %s2663_s25 = smov 24   ;;  %s2664_s26 = smov 28  }
  0x13   : > { %s2711_s19 = scalar_lea.vmem %s3896_s0, %s1930_s16  ;;  %s2665_s27 = smov 32  }
  0x14   : > { %v2714_v0 = vld [vmem:[%s2711_s19 + $0x30] sm:$0xff]  ;;  %v2717_v1 = vld [vmem:[%s2711_s19 + $0x38] sm:$0xff]  ;;  %v2720_v2 = vld [vmem:[%s2711_s19 + $0x40] sm:$0x3]  ;;  %s1811_s30 = sshll.u32 %s3980_s12, 3 }
  0x15   : > { %v308_v3 = vrot.slane %v2714_v0, 1  ;;  %v309_v4 = vrot.slane %v2717_v1, 1  ;;  %v311_v5 = vrot.slane %v2720_v2, 1  ;;  %v2726_v6 = vld [vmem:[%s2711_s19] sm:$0xff]  ;;  %v2729_v7 = vld [vmem:[%s2711_s19 + $0x8] sm:$0xff]  ;;  %v2740_v12 = vld [vmem:[%s2711_s19 + $0x50] sm:$0xff]  ;;  %s187_s6 = scalar_lea.vmem %s3898_s2, %s1811_s30  ;;  %s191_s9 = scalar_lea.vmem %s3899_s3, %s1811_s30 }
  0x16   : > { %3931 = vst [vmem:[#allocation2_spill] sm:$0xff] %v2726_v6  ;;  %3932 = vst [vmem:[#allocation3_spill] sm:$0xff] %v2729_v7  ;;  %v2732_v8 = vld [vmem:[%s2711_s19 + $0x10] sm:$0x3]  ;;  %v298_v9 = vrot.slane %v2726_v6, 1  ;;  %v299_v10 = vrot.slane %v2729_v7, 1 }
  0x17   : > { %v2737_v11 = vld [vmem:[%s2711_s19 + $0x48] sm:$0xff]  ;;  %v310_v13 = vsel %vm297_vm0, %v308_v3, %v309_v4  ;;  %v312_v14 = vsel %vm297_vm0, %v309_v4, %v311_v5  ;;  %v301_v15 = vrot.slane %v2732_v8, 1  ;;  %v2746_v16 = vld [vmem:[%s2711_s19 + $0x58] sm:$0x3]  ;;  %v2752_v18 = vld [vmem:[%s2711_s19 + $0x20] sm:$0xff]  ;;  %v314_v22 = vrot.slane %v2740_v12, 1 }
  0x18   : > { %v2749_v17 = vld [vmem:[%s2711_s19 + $0x18] sm:$0xff]  ;;  %v2754_v19 = vpack.i.bf16 %v312_v14, %v310_v13  ;;  %v300_v20 = vsel %vm297_vm0, %v298_v9, %v299_v10  ;;  %v313_v21 = vrot.slane %v2737_v11, 1  ;;  %v2760_v23 = vld [vmem:[%s2711_s19 + $0x28] sm:$0x3]  ;;  %v2766_v25 = vld [vmem:[%s2711_s19 + $0x80] sm:$0xff]  ;;  %v316_v27 = vrot.slane %v2746_v16, 1 }
  0x19   : > { %v2763_v24 = vld [vmem:[%s2711_s19 + $0x78] sm:$0xff]  ;;  %v302_v26 = vsel %vm297_vm0, %v299_v10, %v301_v15  ;;  %v303_v28 = vrot.slane %v2749_v17, 1  ;;  %v304_v29 = vrot.slane %v2752_v18, 1  ;;  %v2773_v30 = vld [vmem:[%s2711_s19 + $0x88] sm:$0x3]  ;;  %v2776_v31 = vld [vmem:[%s2711_s19 + $0x60] sm:$0xff] }
  0x1a   : > { %3933 = vst [vmem:[#allocation4_spill] sm:$0xff] %v2754_v19  ;;  %1975 = vrot.lane.b32.xlu1 %v2754_v19, %s2658_s20  ;;  %v1964_v32 = vpack.i.bf16 %v302_v26, %v300_v20  ;;  %v315_v33 = vsel %vm297_vm0, %v313_v21, %v314_v22  ;;  %v306_v34 = vrot.slane %v2760_v23, 1  ;;  %v323_v35 = vrot.slane %v2763_v24, 1  ;;  %v2784_v36 = vld [vmem:[%s2711_s19 + $0x68] sm:$0xff]  ;;  %v2787_v37 = vld [vmem:[%s2711_s19 + $0x70] sm:$0x3] }
  0x1b   : > { %v317_v38 = vsel %vm297_vm0, %v314_v22, %v316_v27  ;;  %v305_v39 = vsel %vm297_vm0, %v303_v28, %v304_v29  ;;  %v324_v40 = vrot.slane %v2766_v25, 1  ;;  %v326_v41 = vrot.slane %v2773_v30, 1  ;;  %v2794_v42 = vld [vmem:[%s2711_s19 + $0xa8] sm:$0xff]  ;;  %v2797_v43 = vld [vmem:[%s2711_s19 + $0xb0] sm:$0xff]  ;;  %v2806_v48 = vld [vmem:[%s2711_s19 + $0xb8] sm:$0x3] }
  0x1c   : > { %1965 = vrot.lane.b32.xlu0 %v1964_v32, %s2658_s20  ;;  %v2800_v44 = vpack.i.bf16 %v317_v38, %v315_v33  ;;  %v307_v45 = vsel %vm297_vm0, %v304_v29, %v306_v34  ;;  %v318_v46 = vrot.slane %v2776_v31, 1  ;;  %v319_v47 = vrot.slane %v2784_v36, 1  ;;  %v2809_v49 = vld [vmem:[%s2711_s19 + $0x90] sm:$0xff]  ;;  %v2812_v50 = vld [vmem:[%s2711_s19 + $0x98] sm:$0xff]  ;;  %v2820_v55 = vld [vmem:[%s2711_s19 + $0xa0] sm:$0x3] }
  0x1d   : > { %v2814_v51 = vpack.i.bf16 %v307_v45, %v305_v39  ;;  %v325_v52 = vsel %vm297_vm0, %v323_v35, %v324_v40  ;;  %v327_v53 = vsel %vm297_vm0, %v324_v40, %v326_v41  ;;  %v321_v54 = vrot.slane %v2787_v37, 1  ;;  %v2823_v56 = vld [vmem:[%s2711_s19 + $0xd8] sm:$0xff]  ;;  %v2833_v61 = vld [vmem:[%s2711_s19 + $0xe0] sm:$0xff]  ;;  %v2836_v62 = vld [vmem:[%s2711_s19 + $0xe8] sm:$0x3] }
  0x1e   : > { %3934 = vst [vmem:[#allocation5_spill] sm:$0xff] %v2800_v44  ;;  %1980 = vrot.lane.b32.xlu1 %v2800_v44, %s2658_s20  ;;  %v2827_v57 = vpack.i.bf16 %v327_v53, %v325_v52  ;;  %v320_v58 = vsel %vm297_vm0, %v318_v46, %v319_v47  ;;  %v333_v59 = vrot.slane %v2794_v42, 1  ;;  %v334_v60 = vrot.slane %v2797_v43, 1  ;;  %v2843_v9 = vld [vmem:[%s2711_s19 + $0xc0] sm:$0xff]  ;;  %v2846_v10 = vld [vmem:[%s2711_s19 + $0xc8] sm:$0xff]  ;;  %v2866_v32 = vld [vmem:[%s2711_s19 + $0x110] sm:$0xff] }
  0x1f   : > { %v322_v63 = vsel %vm297_vm0, %v319_v47, %v321_v54  ;;  %v336_v3 = vrot.slane %v2806_v48, 1  ;;  %v328_v4 = vrot.slane %v2809_v49, 1  ;;  %v329_v5 = vrot.slane %v2812_v50, 1  ;;  %v2856_v21 = vld [vmem:[%s2711_s19 + $0xd0] sm:$0x3]  ;;  %v2863_v29 = vld [vmem:[%s2711_s19 + $0x108] sm:$0xff] }
  0x20   : > { %3935 = vst [vmem:[#allocation6_spill] sm:$0xff] %v2827_v57  ;;  %1970 = vrot.lane.b32.xlu0 %v2814_v51, %s2658_s20  ;;  %v2850_v13 = vpack.i.bf16 %v322_v63, %v320_v58  ;;  %v335_v14 = vsel %vm297_vm0, %v333_v59, %v334_v60  ;;  %v331_v15 = vrot.slane %v2820_v55, 1  ;;  %v343_v20 = vrot.slane %v2823_v56, 1  ;;  %v2876_v39 = vld [vmem:[%s2711_s19 + $0x118] sm:$0x3]  ;;  %v2879_v40 = vld [vmem:[%s2711_s19 + $0xf0] sm:$0xff] }
  0x21   : > { %v337_v22 = vsel %vm297_vm0, %v334_v60, %v336_v3  ;;  %v330_v26 = vsel %vm297_vm0, %v328_v4, %v329_v5  ;;  %v344_v27 = vrot.slane %v2833_v61, 1  ;;  %v346_v28 = vrot.slane %v2836_v62, 1  ;;  %v2882_v41 = vld [vmem:[%s2711_s19 + $0xf8] sm:$0xff]  ;;  %v2888_v52 = vld [vmem:[%s2711_s19 + $0x100] sm:$0x3] }
  0x22   : > { %3936 = vst [vmem:[#allocation7_spill] sm:$0xff] %v2850_v13  ;;  %1990 = vrot.lane.b32.xlu1 %v2827_v57, %s2658_s20  ;;  %v2870_v33 = vpack.i.bf16 %v337_v22, %v335_v14  ;;  %v332_v34 = vsel %vm297_vm0, %v329_v5, %v331_v15  ;;  %v338_v35 = vrot.slane %v2843_v9, 1  ;;  %v339_v38 = vrot.slane %v2846_v10, 1  ;;  %v2891_v53 = vld [vmem:[%s2711_s19 + $0x138] sm:$0xff]  ;;  %v2901_v63 = vld [vmem:[%s2711_s19 + $0x140] sm:$0xff] }
  0x23   : > { %v345_v45 = vsel %vm297_vm0, %v343_v20, %v344_v27  ;;  %v347_v46 = vsel %vm297_vm0, %v344_v27, %v346_v28  ;;  %v341_v47 = vrot.slane %v2856_v21, 1  ;;  %3938 = vst [vmem:[#allocation9_spill] sm:$0xff] %v2891_v53  ;;  %v2895_v54 = vpack.i.bf16 %v332_v34, %v330_v26  ;;  %3940 = vst [vmem:[#allocation11_spill] sm:$0xff] %v2901_v63  ;;  %v2904_v3 = vld [vmem:[%s2711_s19 + $0x148] sm:$0x3]  ;;  %v2918_v28 = vld [vmem:[%s2711_s19 + $0x120] sm:$0xff] }
  0x24   : > { %3937 = vst [vmem:[#allocation8_spill] sm:$0xff] %v2870_v33  ;;  %1985 = vrot.lane.b32.xlu0 %v2850_v13, %s2658_s20  ;;  %v340_v58 = vsel %vm297_vm0, %v338_v35, %v339_v38  ;;  %v353_v59 = vrot.slane %v2863_v29, 1  ;;  %v354_v60 = vrot.slane %v2866_v32, 1  ;;  %3941 = vst [vmem:[#allocation12_spill] sm:$0xff] %v2904_v3  ;;  %v356_v5 = vrot.slane %v2876_v39, 1  ;;  %v2921_v34 = vld [vmem:[%s2711_s19 + $0x128] sm:$0xff] }
  0x25   : > { %3939 = vst [vmem:[#allocation10_spill] sm:$0xff] %v2895_v54  ;;  %v342_v4 = vsel %vm297_vm0, %v339_v38, %v341_v47  ;;  %v348_v14 = vrot.slane %v2879_v40, 1  ;;  %v349_v15 = vrot.slane %v2882_v41, 1  ;;  %v2912_v20 = vpack.i.bf16 %v347_v46, %v345_v45  ;;  %v2924_v35 = vld [vmem:[%s2711_s19 + $0x130] sm:$0x3]  ;;  %v2930_v47 = vld [vmem:[%s2711_s19 + $0x168] sm:$0xff] }
  0x26   : > { %2000 = vrot.lane.b32.xlu1 %v2870_v33, %s2658_s20  ;;  %v355_v22 = vsel %vm297_vm0, %v353_v59, %v354_v60  ;;  %v351_v26 = vrot.slane %v2888_v52, 1  ;;  %v363_v27 = vrot.slane %v2891_v53, 1  ;;  %3942 = vst [vmem:[#allocation13_spill] sm:$0xff] %v2924_v35  ;;  %v357_v38 = vsel %vm297_vm0, %v354_v60, %v356_v5  ;;  %3943 = vst [vmem:[#allocation14_spill] sm:$0xff] %v2930_v47  ;;  %v2933_v59 = vld [vmem:[%s2711_s19 + $0x170] sm:$0xff]  ;;  %v2953_v19 = vld [vmem:[%s2711_s19 + $0x158] sm:$0xff] }
  0x27   : > { %v364_v45 = vrot.slane %v2901_v63, 1  ;;  %v366_v46 = vrot.slane %v2904_v3, 1  ;;  %3944 = vst [vmem:[#allocation15_spill] sm:$0xff] %v2933_v59  ;;  %v2937_v33 = vpack.i.bf16 %v342_v4, %v340_v58  ;;  %v2939_v57 = vpack.i.bf16 %v357_v38, %v355_v22  ;;  %v2943_v13 = vld [vmem:[%s2711_s19 + $0x178] sm:$0x3]  ;;  %v2946_v60 = vld [vmem:[%s2711_s19 + $0x150] sm:$0xff] }
  0x28   : > { %1995 = vrot.lane.b32.xlu0 %v2895_v54, %s2658_s20  ;;  %v350_v53 = vsel %vm297_vm0, %v348_v14, %v349_v15  ;;  %3946 = vst [vmem:[#allocation17_spill] sm:$0xff] %v2943_v13  ;;  %v352_v5 = vsel %vm297_vm0, %v349_v15, %v351_v26  ;;  %v358_v3 = vrot.slane %v2918_v28, 1  ;;  %v359_v63 = vrot.slane %v2921_v34, 1  ;;  %v2956_v58 = vld [vmem:[%s2711_s19 + $0x160] sm:$0x3] }
  0x29   : > { %3945 = vst [vmem:[#allocation16_spill] sm:$0xff] %v2937_v33  ;;  %v361_v44 = vrot.slane %v2924_v35, 1  ;;  %v365_v4 = vsel %vm297_vm0, %v363_v27, %v364_v45  ;;  %v367_v14 = vsel %vm297_vm0, %v364_v45, %v366_v46  ;;  %v373_v22 = vrot.slane %v2930_v47, 1 }
  0x2a   : > { %2010 = vrot.lane.b32.xlu1 %v2912_v20, %s2658_s20  ;;  %v374_v15 = vrot.slane %v2933_v59, 1  ;;  %v376_v26 = vrot.slane %v2943_v13, 1  ;;  %v368_v38 = vrot.slane %v2946_v60, 1  ;;  %v478_v54 = vrot.slane %v2732_v8, 2 }
  0x2b   : > { %v2969_v35 = vpack.i.bf16 %v352_v5, %v350_v53  ;;  %v369_v27 = vrot.slane %v2953_v19, 1  ;;  %v371_v45 = vrot.slane %v2956_v58, 1  ;;  %v2973_v46 = vpack.i.bf16 %v367_v14, %v365_v4 }
  0x2c   : > { %2005 = vrot.lane.b32.xlu0 %v2937_v33, %s2658_s20  ;;  %v360_v59 = vsel %vm297_vm0, %v358_v3, %v359_v63  ;;  %v362_v47 = vsel %vm297_vm0, %v359_v63, %v361_v44  ;;  %v375_v13 = vsel %vm297_vm0, %v373_v22, %v374_v15  ;;  %v377_v8 = vsel %vm297_vm0, %v374_v15, %v376_v26 }
  0x2d   : > { %v480_v53 = vrot.slane %v2749_v17, 2  ;;  %v481_v5 = vrot.slane %v2752_v18, 2  ;;  %v483_v33 = vrot.slane %v2760_v23, 2  ;;  %v370_v4 = vsel %vm297_vm0, %v368_v38, %v369_v27 }
  0x2e   : > { %2020 = vrot.lane.b32.xlu1 %v2939_v57, %s2658_s20  ;;  %v372_v14 = vsel %vm297_vm0, %v369_v27, %v371_v45  ;;  %v475_v3 = vrot.slane %v2726_v6, 2  ;;  %v476_v44 = vrot.slane %v2729_v7, 2  ;;  %v2990_v63 = vpack.i.bf16 %v362_v47, %v360_v59 }
  0x2f   : > { %v490_v22 = vrot.slane %v2737_v11, 2  ;;  %v491_v15 = vrot.slane %v2740_v12, 2  ;;  %v493_v26 = vrot.slane %v2746_v16, 2  ;;  %v488_v23 = vrot.slane %v2720_v2, 2 }
  0x30   : > { %2015 = vrot.lane.b32.xlu0 %v2969_v35, %s2658_s20  ;;  %v2998_v38 = vpack.i.bf16 %v377_v8, %v375_v13  ;;  %v3000_v27 = vpack.i.bf16 %v372_v14, %v370_v4  ;;  %v482_v45 = vsel %vm474_vm1, %v480_v53, %v481_v5  ;;  %v484_v47 = vsel %vm474_vm1, %v481_v5, %v483_v33 }
  0x31   : > { %v477_v59 = vsel %vm474_vm1, %v475_v3, %v476_v44  ;;  %v479_v6 = vsel %vm474_vm1, %v476_v44, %v478_v54  ;;  %v485_v7 = vrot.slane %v2714_v0, 2  ;;  %v486_v16 = vrot.slane %v2717_v1, 2 }
  0x32   : > { %2030 = vrot.lane.b32.xlu1 %v2973_v46, %s2658_s20  ;;  %v492_v2 = vsel %vm474_vm1, %v490_v22, %v491_v15  ;;  %v494_v13 = vsel %vm474_vm1, %v491_v15, %v493_v26  ;;  %v500_v8 = vrot.slane %v2763_v24, 2  ;;  %v501_v53 = vrot.slane %v2766_v25, 2 }
  0x33   : > { %v3016_v33 = vpack.i.bf16 %v484_v47, %v482_v45  ;;  %v503_v54 = vrot.slane %v2773_v30, 2  ;;  %v2044_v5 = vpack.i.bf16 %v479_v6, %v477_v59  ;;  %v3019_v4 = vpack.i.bf16 %v494_v13, %v492_v2 }
  0x34   : > { %2025 = vrot.lane.b32.xlu0 %v2990_v63, %s2658_s20  ;;  %v487_v14 = vsel %vm474_vm1, %v485_v7, %v486_v16  ;;  %v489_v3 = vsel %vm474_vm1, %v486_v16, %v488_v23  ;;  %v502_v44 = vsel %vm474_vm1, %v500_v8, %v501_v53  ;;  %v495_v22 = vrot.slane %v2776_v31, 2 }
  0x35   : > { %v496_v15 = vrot.slane %v2784_v36, 2  ;;  %v498_v26 = vrot.slane %v2787_v37, 2  ;;  %v510_v30 = vrot.slane %v2794_v42, 2  ;;  %v511_v6 = vrot.slane %v2797_v43, 2 }
  0x36   : > { %2040 = vrot.lane.b32.xlu1 %v2998_v38, %s2658_s20  ;;  %v513_v45 = vrot.slane %v2806_v48, 2  ;;  %v504_v7 = vsel %vm474_vm1, %v501_v53, %v503_v54  ;;  %v505_v23 = vrot.slane %v2809_v49, 2  ;;  %v506_v47 = vrot.slane %v2812_v50, 2 }
  0x37   : > { %v508_v59 = vrot.slane %v2820_v55, 2  ;;  %v3039_v37 = vpack.i.bf16 %v489_v3, %v487_v14  ;;  %v497_v16 = vsel %vm474_vm1, %v495_v22, %v496_v15  ;;  %v3042_v2 = vpack.i.bf16 %v504_v7, %v502_v44 }
  0x38   : > { %2035 = vrot.lane.b32.xlu0 %v3000_v27, %s2658_s20  ;;  %v499_v48 = vsel %vm474_vm1, %v496_v15, %v498_v26  ;;  %v512_v13 = vsel %vm474_vm1, %v510_v30, %v511_v6  ;;  %v514_v8 = vsel %vm474_vm1, %v511_v6, %v513_v45  ;;  %v507_v53 = vsel %vm474_vm1, %v505_v23, %v506_v47 }
  0x39   : > { %v509_v55 = vsel %vm474_vm1, %v506_v47, %v508_v59  ;;  %v520_v54 = vrot.slane %v2823_v56, 2  ;;  %v523_v14 = vrot.slane %v2836_v62, 2  ;;  %v3056_v3 = vpack.i.bf16 %v499_v48, %v497_v16 }
  0x3a   : > { %2050 = vrot.lane.b32.xlu1 %v3016_v33, %s2659_s21  ;;  %v3058_v44 = vpack.i.bf16 %v514_v8, %v512_v13  ;;  %v515_v22 = vrot.slane %v2843_v9, 2  ;;  %v3061_v15 = vpack.i.bf16 %v509_v55, %v507_v53  ;;  %v516_v26 = vrot.slane %v2846_v10, 2 }
  0x3b   : > { %v518_v30 = vrot.slane %v2856_v21, 2  ;;  %v530_v6 = vrot.slane %v2863_v29, 2  ;;  %v531_v45 = vrot.slane %v2866_v32, 2  ;;  %v533_v23 = vrot.slane %v2876_v39, 2 }
  0x3c   : > { %2045 = vrot.lane.b32.xlu0 %v2044_v5, %s2659_s21  ;;  %v521_v5 = vrot.slane %v2833_v61, 2  ;;  %v525_v47 = vrot.slane %v2879_v40, 2  ;;  %v526_v21 = vrot.slane %v2882_v41, 2  ;;  %v517_v59 = vsel %vm474_vm1, %v515_v22, %v516_v26 }
  0x3d   : > { %v519_v16 = vsel %vm474_vm1, %v516_v26, %v518_v30  ;;  %v528_v48 = vrot.slane %v2888_v52, 2  ;;  %v532_v39 = vsel %vm474_vm1, %v530_v6, %v531_v45  ;;  %v534_v8 = vsel %vm474_vm1, %v531_v45, %v533_v23 }
  0x3e   : > { %2060 = vrot.lane.b32.xlu1 %v3019_v4, %s2659_s21  ;;  %v522_v62 = vsel %vm474_vm1, %v520_v54, %v521_v5  ;;  %v524_v7 = vsel %vm474_vm1, %v521_v5, %v523_v14  ;;  %v3087_v53 = vpack.i.bf16 %v519_v16, %v517_v59  ;;  %v527_v55 = vsel %vm474_vm1, %v525_v47, %v526_v21  ;;  %v3953_v59 = vld [vmem:[#allocation11_spill] sm:$0xff] }
  0x3f   : > { %v3081_v13 = vpack.i.bf16 %v524_v7, %v522_v62  ;;  %v529_v54 = vsel %vm474_vm1, %v526_v21, %v528_v48  ;;  %v2099_v52 = vpack.i.bf16 %v534_v8, %v532_v39  ;;  %v2109_v14 = vpack.i.bf16 %v2752_v18, %v2749_v17  ;;  %v3952_v21 = vld [vmem:[#allocation9_spill] sm:$0xff]  ;;  %v3954_v39 = vld [vmem:[#allocation12_spill] sm:$0xff] }
  0x40   : > { %2055 = vrot.lane.b32.xlu0 %v3039_v37, %s2659_s21  ;;  %v2094_v5 = vpack.i.bf16 %v529_v54, %v527_v55  ;;  %v2104_v22 = vpack.i.bf16 %v2833_v61, %v2823_v56  ;;  %v2139_v17 = vpack.i.bf16 %v2717_v1, %v2714_v0  ;;  %v2134_v18 = vpack.i.bf16 %v2882_v41, %v2879_v40  ;;  %v3948_v56 = vld [vmem:[#allocation5_spill] sm:$0xff] }
  0x41   : > { %v2199_v0 = vpack.i.bf16 %v2740_v12, %v2737_v11  ;;  %v2194_v1 = vpack.i.bf16 %v2866_v32, %v2863_v29  ;;  %v2259_v11 = vpack.i.bf16 %v2784_v36, %v2776_v31  ;;  %v2254_v61 = vpack.i.bf16 %v2921_v34, %v2918_v28  ;;  %v3949_v40 = vld [vmem:[#allocation13_spill] sm:$0xff] }
  0x42   : > { %2070 = vrot.lane.b32.xlu1 %v3042_v2, %s2659_s21  ;;  %v535_v29 = vrot.slane %v2918_v28, 2  ;;  %v536_v32 = vrot.slane %v2921_v34, 2  ;;  %v538_v41 = vrot.slane %v3949_v40, 2  ;;  %v3950_v28 = vld [vmem:[#allocation7_spill] sm:$0xff]  ;;  %v2319_v23 = vpack.i.bf16 %v2766_v25, %v2763_v24 }
  0x43   : > { %v2314_v16 = vpack.i.bf16 %v3953_v59, %v3952_v21  ;;  %v540_v48 = vrot.slane %v3952_v21, 2  ;;  %v543_v8 = vrot.slane %v3954_v39, 2 }
  0x44   : > { %2065 = vrot.lane.b32.xlu0 %v3056_v3, %s2659_s21  ;;  %v537_v36 = vsel %vm474_vm1, %v535_v29, %v536_v32  ;;  %v546_v29 = vrot.slane %v2953_v19, 2 }
  0x46   : > { %2080 = vrot.lane.b32.xlu1 %v3058_v44, %s2659_s21 }
  0x48   : > { %2075 = vrot.lane.b32.xlu0 %v3061_v15, %s2659_s21 }
  0x4a   : > { %2090 = vrot.lane.b32.xlu1 %v3081_v13, %s2659_s21 }
  0x4c   : > { %2085 = vrot.lane.b32.xlu0 %v3087_v53, %s2659_s21 }
  0x4e   : > { %2100 = vrot.lane.b32.xlu1 %v2099_v52, %s2659_s21 }
  0x50   : > { %2095 = vrot.lane.b32.xlu0 %v2094_v5, %s2659_s21 }
  0x52   : > { %2110 = vrot.lane.b32.xlu1 %v2109_v14, %s2660_s22 }
  0x54   : > { %2105 = vrot.lane.b32.xlu0 %v2104_v22, %s2660_s22 }
  0x56   : > { %2120 = vrot.lane.b32.xlu1 %v2814_v51, %s2661_s23  ;;  %v3947_v51 = vld [vmem:[#allocation4_spill] sm:$0xff] }
  0x58   : > { %2115 = vrot.lane.b32.xlu0 %v2912_v20, %s2661_s23 }
  0x5a   : > { %2130 = vrot.lane.b32.xlu1 %v3016_v33, %s2662_s24 }
  0x5c   : > { %2125 = vrot.lane.b32.xlu0 %v3081_v13, %s2662_s24 }
  0x5e   : > { %2140 = vrot.lane.b32.xlu1 %v2139_v17, %s2663_s25 }
  0x60   : > { %2135 = vrot.lane.b32.xlu0 %v2134_v18, %s2663_s25 }
  0x62   : > { %2150 = vrot.lane.b32.xlu1 %v3947_v51, %s2664_s26 }
  0x64   : > { %2145 = vrot.lane.b32.xlu0 %v2969_v35, %s2664_s26 }
  0x66   : > { %2160 = vrot.lane.b32.xlu1 %v3039_v37, %s2665_s27 }
  0x68   : > { %2155 = vrot.lane.b32.xlu0 %v2094_v5, %s2665_s27 }
  0x6a   : > { %2170 = vrot.lane.b32.xlu1 %v2139_v17, %s2660_s22 }
  0x6c   : > { %2165 = vrot.lane.b32.xlu0 %v2134_v18, %s2660_s22 }
  0x6e   : > { %2180 = vrot.lane.b32.xlu1 %v3947_v51, %s2661_s23 }
  0x70   : > { %2175 = vrot.lane.b32.xlu0 %v2969_v35, %s2661_s23  ;;  %v539_v35 = vsel %vm474_vm1, %v536_v32, %v538_v41  ;;  %v548_v32 = vrot.slane %v2956_v58, 2 }
  0x72   : > { %2190 = vrot.lane.b32.xlu1 %v3039_v37, %s2662_s24 }
  0x74   : > { %2185 = vrot.lane.b32.xlu0 %v2094_v5, %s2662_s24 }
  0x76   : > { %2200 = vrot.lane.b32.xlu1 %v2199_v0, %s2663_s25 }
  0x78   : > { %2195 = vrot.lane.b32.xlu0 %v2194_v1, %s2663_s25 }
  0x7a   : > { %2210 = vrot.lane.b32.xlu1 %v3948_v56, %s2664_s26 }
  0x7c   : > { %2205 = vrot.lane.b32.xlu0 %v2939_v57, %s2664_s26 }
  0x7e   : > { %2220 = vrot.lane.b32.xlu1 %v3019_v4, %s2665_s27 }
  0x80   : > { %2215 = vrot.lane.b32.xlu0 %v2099_v52, %s2665_s27 }
  0x82   : > { %2230 = vrot.lane.b32.xlu1 %v2199_v0, %s2660_s22 }
  0x84   : > { %2225 = vrot.lane.b32.xlu0 %v2194_v1, %s2660_s22 }
  0x86   : > { %2240 = vrot.lane.b32.xlu1 %v3948_v56, %s2661_s23 }
  0x88   : > { %2235 = vrot.lane.b32.xlu0 %v2939_v57, %s2661_s23 }
  0x8a   : > { %2250 = vrot.lane.b32.xlu1 %v3019_v4, %s2662_s24  ;;  %v2274_v4 = vpack.i.bf16 %v539_v35, %v537_v36  ;;  %v549_v36 = vsel %vm474_vm1, %v546_v29, %v548_v32 }
  0x8c   : > { %2245 = vrot.lane.b32.xlu0 %v2099_v52, %s2662_s24  ;;  %v3157_v12 = vpop.permute.xlu1 %1975  ;;  %v3956_v52 = vld [vmem:[#allocation6_spill] sm:$0xff] }
  0x8e   : > { %v3164_v57 = vpop.permute.xlu0 %1965  ;;  %2260 = vrot.lane.b32.xlu1 %v2259_v11, %s2663_s25 }
  0x90   : > { %2255 = vrot.lane.b32.xlu0 %v2254_v61, %s2663_s25  ;;  %v3168_v31 = vpop.permute.xlu1 %1980 }
  0x92   : > { %v3172_v33 = vpop.permute.xlu0 %1970  ;;  %2270 = vrot.lane.b32.xlu1 %v3950_v28, %s2664_s26 }
  0x94   : > { %2265 = vrot.lane.b32.xlu0 %v2990_v63, %s2664_s26  ;;  %v3178_v34 = vpop.permute.xlu1 %1990 }
  0x96   : > { %v3180_v37 = vpop.permute.xlu0 %1985  ;;  %2280 = vrot.lane.b32.xlu1 %v3056_v3, %s2665_s27 }
  0x98   : > { %2275 = vrot.lane.b32.xlu0 %v2274_v4, %s2665_s27  ;;  %v3185_v26 = vpop.permute.xlu1 %2000 }
  0x99   : > { %3951 = vst [vmem:[#allocation4_spill] sm:$0xff] %v3185_v26 }
  0x9a   : > { %v3187_v30 = vpop.permute.xlu0 %1995  ;;  %2290 = vrot.lane.b32.xlu1 %v2259_v11, %s2660_s22  ;;  %v2379_v11 = vpack.i.bf16 %v2953_v19, %v2946_v60  ;;  %v2384_v19 = vpack.i.bf16 %v2812_v50, %v2809_v49  ;;  %v3959_v49 = vld [vmem:[#allocation17_spill] sm:$0xff] }
  0x9c   : > { %2285 = vrot.lane.b32.xlu0 %v2254_v61, %s2660_s22  ;;  %v3191_v62 = vpop.permute.xlu1 %2010  ;;  %v545_v61 = vrot.slane %v2946_v60, 2 }
  0x9e   : > { %v3193_v6 = vpop.permute.xlu0 %2005  ;;  %2300 = vrot.lane.b32.xlu1 %v3950_v28, %s2661_s23  ;;  %v547_v41 = vsel %vm474_vm1, %v545_v61, %v546_v29 }
  0x9f   : > { %v3276_v35 = vpack.i.bf16 %v549_v36, %v547_v41  ;;  %v3962_v36 = vld [vmem:[#allocation3_spill] sm:$0xff] }
  0xa0   : > { %2295 = vrot.lane.b32.xlu0 %v2990_v63, %s2661_s23  ;;  %v3199_v45 = vpop.permute.xlu1 %2020  ;;  %v541_v63 = vrot.slane %v3953_v59, 2  ;;  %v1968_v59 = vunpack.i.h.bf16 %v3164_v57 }
  0xa2   : > { %v3201_v7 = vpop.permute.xlu0 %2015  ;;  %2310 = vrot.lane.b32.xlu1 %v3056_v3, %s2662_s24  ;;  %v542_v25 = vsel %vm474_vm1, %v540_v48, %v541_v63  ;;  %v544_v3 = vsel %vm474_vm1, %v541_v63, %v543_v8  ;;  %v2008_v48 = vunpack.i.h.bf16 %v3193_v6  ;;  %v2007_v63 = vunpack.i.l.bf16 %v3193_v6 }
  0xa3   : > { %v2334_v14 = vpack.i.bf16 %v544_v3, %v542_v25  ;;  %v3295_v8 = vpack.i.bf16 %v2797_v43, %v2794_v42  ;;  %v1255_v42 = vsel %vm1253_vm2, %v3962_v36, %v1968_v59  ;;  %v3963_v43 = vld [vmem:[#allocation2_spill] sm:$0xff] }
  0xa4   : > { %2305 = vrot.lane.b32.xlu0 %v2274_v4, %s2662_s24  ;;  %v3208_v47 = vpop.permute.xlu1 %2030 }
  0xa6   : > { %v3215_v55 = vpop.permute.xlu0 %2025  ;;  %2320 = vrot.lane.b32.xlu1 %v2319_v23, %s2663_s25 }
  0xa8   : > { %2315 = vrot.lane.b32.xlu0 %v2314_v16, %s2663_s25  ;;  %v3219_v24 = vpop.permute.xlu1 %2040 }
  0xa9   : > { %3955 = vst [vmem:[#allocation5_spill] sm:$0xff] %v3219_v24 }
  0xaa   : > { %v3223_v54 = vpop.permute.xlu0 %2035  ;;  %2330 = vrot.lane.b32.xlu1 %v3956_v52, %s2664_s26 }
  0xac   : > { %2325 = vrot.lane.b32.xlu0 %v2973_v46, %s2664_s26  ;;  %v3229_v5 = vpop.permute.xlu1 %2050 }
  0xae   : > { %v3231_v22 = vpop.permute.xlu0 %2045  ;;  %2340 = vrot.lane.b32.xlu1 %v3042_v2, %s2665_s27 }
  0xaf   : > { %v2048_v25 = vunpack.i.h.bf16 %v3231_v22  ;;  %v2047_v3 = vunpack.i.l.bf16 %v3231_v22 }
  0xb0   : > { %2335 = vrot.lane.b32.xlu0 %v2334_v14, %s2665_s27  ;;  %v3236_v17 = vpop.permute.xlu1 %2060 }
  0xb2   : > { %v3238_v18 = vpop.permute.xlu0 %2055  ;;  %2350 = vrot.lane.b32.xlu1 %v2314_v16, %s2660_s22  ;;  %v1967_v16 = vunpack.i.l.bf16 %v3164_v57  ;;  %v3961_v57 = vld [vmem:[#allocation15_spill] sm:$0xff] }
  0xb4   : > { %2345 = vrot.lane.b32.xlu0 %v2274_v4, %s2659_s21  ;;  %v3242_v51 = vpop.permute.xlu1 %2070  ;;  %v1254_v50 = vsel %vm1253_vm2, %v3963_v43, %v1967_v16  ;;  %v1288_v16 = vsel %vm1286_vm3, %v1255_v42, %v2048_v25 }
  0xb5   : > { %v1287_v59 = vsel %vm1286_vm3, %v1254_v50, %v2047_v3 }
  0xb6   : > { %v3244_v0 = vpop.permute.xlu0 %2065  ;;  %2360 = vrot.lane.b32.xlu1 %v2973_v46, %s2661_s23 }
  0xb8   : > { %2355 = vrot.lane.b32.xlu0 %v2319_v23, %s2660_s22  ;;  %v3249_v1 = vpop.permute.xlu1 %2080 }
  0xb9   : > { %3957 = vst [vmem:[#allocation13_spill] sm:$0xff] %v3249_v1 }
  0xba   : > { %v3251_v56 = vpop.permute.xlu0 %2075  ;;  %2370 = vrot.lane.b32.xlu1 %v2334_v14, %s2662_s24 }
  0xbc   : > { %2365 = vrot.lane.b32.xlu0 %v3956_v52, %s2661_s23  ;;  %v3261_v46 = vpop.permute.xlu1 %2090  ;;  %v3960_v52 = vld [vmem:[#allocation14_spill] sm:$0xff] }
  0xbe   : > { %v2086_v40 = vpop.permute.xlu0 %2085  ;;  %2380 = vrot.lane.b32.xlu1 %v2379_v11, %s2663_s25 }
  0xbf   : > { %v2088_v61 = vunpack.i.h.bf16 %v2086_v40  ;;  %v2087_v29 = vunpack.i.l.bf16 %v2086_v40  ;;  %v1271_v40 = vsel %vm1253_vm2, %v2846_v10, %v2008_v48 }
  0xc0   : > { %2375 = vrot.lane.b32.xlu0 %v3042_v2, %s2662_s24  ;;  %v3268_v60 = vpop.permute.xlu1 %2100  ;;  %v3958_v2 = vld [vmem:[#allocation10_spill] sm:$0xff] }
  0xc1   : > { %v1304_v1 = vsel %vm1286_vm3, %v1271_v40, %v2088_v61 }
  0xc2   : > { %v3272_v58 = vpop.permute.xlu0 %2095  ;;  %2390 = vrot.lane.b32.xlu1 %v3000_v27, %s2664_s26 }
  0xc4   : > { %2385 = vrot.lane.b32.xlu0 %v2384_v19, %s2663_s25  ;;  %v2111_v28 = vpop.permute.xlu1 %2110 }
  0xc5   : > { %v2113_v6 = vunpack.i.h.bf16 %v2111_v28  ;;  %v2112_v32 = vunpack.i.l.bf16 %v2111_v28  ;;  %v1270_v28 = vsel %vm1253_vm2, %v2843_v9, %v2007_v63 }
  0xc6   : > { %v2106_v4 = vpop.permute.xlu0 %2105  ;;  %2400 = vrot.lane.b32.xlu1 %v3276_v35, %s2665_s27  ;;  %v1303_v22 = vsel %vm1286_vm3, %v1270_v28, %v2087_v29 }
  0xc7   : > { %v2108_v24 = vunpack.i.h.bf16 %v2106_v4  ;;  %v1320_v10 = vsel %vm1319_vm4, %v1287_v59, %v2112_v32  ;;  %v1321_v9 = vsel %vm1319_vm4, %v1288_v16, %v2113_v6 }
  0xc8   : > { %2395 = vrot.lane.b32.xlu0 %v3958_v2, %s2664_s26  ;;  %v2121_v23 = vpop.permute.xlu1 %2120 }
  0xc9   : > { %v2123_v36 = vunpack.i.h.bf16 %v2121_v23  ;;  %v2122_v43 = vunpack.i.l.bf16 %v2121_v23  ;;  %v1337_v25 = vsel %vm1319_vm4, %v1304_v1, %v2108_v24 }
  0xca   : > { %v3284_v21 = vpop.permute.xlu0 %2115  ;;  %2410 = vrot.lane.b32.xlu1 %v2334_v14, %s2659_s21  ;;  %v3301_v14 = vpack.i.bf16 %v3961_v57, %v3960_v52 }
  0xcb   : > { %v1353_v6 = vsel %vm1352_vm5, %v1320_v10, %v2122_v43 }
  0xcc   : > { %2405 = vrot.lane.b32.xlu0 %v3061_v15, %s2665_s27  ;;  %v2131_v39 = vpop.permute.xlu1 %2130 }
  0xcd   : > { %v2133_v50 = vunpack.i.h.bf16 %v2131_v39  ;;  %v2132_v63 = vunpack.i.l.bf16 %v2131_v39 }
  0xce   : > { %v2126_v41 = vpop.permute.xlu0 %2125  ;;  %2420 = vrot.lane.b32.xlu1 %v2384_v19, %s2660_s22  ;;  %v2107_v19 = vunpack.i.l.bf16 %v2106_v4  ;;  %v2117_v4 = vunpack.i.l.bf16 %v3284_v21 }
  0xcf   : > { %v2128_v3 = vunpack.i.h.bf16 %v2126_v41  ;;  %v2127_v61 = vunpack.i.l.bf16 %v2126_v41 }
  0xd0   : > { %2415 = vrot.lane.b32.xlu0 %v2379_v11, %s2660_s22  ;;  %v2141_v26 = vpop.permute.xlu1 %2140  ;;  %v2118_v11 = vunpack.i.h.bf16 %v3284_v21  ;;  %v1336_v23 = vsel %vm1319_vm4, %v1303_v22, %v2107_v19 }
  0xd1   : > { %v2143_v32 = vunpack.i.h.bf16 %v2141_v26  ;;  %v2142_v42 = vunpack.i.l.bf16 %v2141_v26  ;;  %v1369_v24 = vsel %vm1352_vm5, %v1336_v23, %v2117_v4 }
  0xd2   : > { %v2136_v48 = vpop.permute.xlu0 %2135  ;;  %2430 = vrot.lane.b32.xlu1 %v3958_v2, %s2661_s23  ;;  %v1354_v2 = vsel %vm1352_vm5, %v1321_v9, %v2123_v36  ;;  %v1370_v1 = vsel %vm1352_vm5, %v1337_v25, %v2118_v11  ;;  %v1402_v22 = vsel %vm1385_vm6, %v1369_v24, %v2127_v61 }
  0xd3   : > { %v2138_v40 = vunpack.i.h.bf16 %v2136_v48  ;;  %v2137_v21 = vunpack.i.l.bf16 %v2136_v48  ;;  %v1387_v41 = vsel %vm1385_vm6, %v1354_v2, %v2133_v50  ;;  %v1403_v26 = vsel %vm1385_vm6, %v1370_v1, %v2128_v3  ;;  %v245_v2 = vld [vmem:[%s2711_s19 + $0x190] sm:$0x3] }
  0xd4   : > { %2425 = vrot.lane.b32.xlu0 %v3000_v27, %s2661_s23  ;;  %v2151_v29 = vpop.permute.xlu1 %2150  ;;  %v1386_v27 = vsel %vm1385_vm6, %v1353_v6, %v2132_v63  ;;  %v1420_v43 = vsel %vm1418_vm7, %v1387_v41, %v2143_v32  ;;  %v244_v6 = vld [vmem:[%s2711_s19 + $0x188] sm:$0xff]  ;;  %v3968_v41 = vrot.slane %v3959_v49, 2 }
  0xd5   : > { %v2153_v28 = vunpack.i.h.bf16 %v2151_v29  ;;  %v2152_v39 = vunpack.i.l.bf16 %v2151_v29  ;;  %v1435_v48 = vsel %vm1418_vm7, %v1402_v22, %v2137_v21  ;;  %v1436_v11 = vsel %vm1418_vm7, %v1403_v26, %v2138_v40  ;;  %v243_v29 = vld [vmem:[%s2711_s19 + $0x180] sm:$0xff] }
  0xd6   : > { %v2146_v59 = vpop.permute.xlu0 %2145  ;;  %2440 = vrot.lane.b32.xlu1 %v3061_v15, %s2662_s24  ;;  %v1419_v15 = vsel %vm1418_vm7, %v1386_v27, %v2142_v42  ;;  %v3964_v21 = vrot.slane %v3961_v57, 2 }
  0xd7   : > { %v2148_v19 = vunpack.i.h.bf16 %v2146_v59  ;;  %v2147_v16 = vunpack.i.l.bf16 %v2146_v59  ;;  %v1452_v4 = vsel %vm1451_vm8, %v1419_v15, %v2152_v39  ;;  %v1453_v50 = vsel %vm1451_vm8, %v1420_v43, %v2153_v28 }
  0xd8   : > { %2435 = vrot.lane.b32.xlu0 %v3276_v35, %s2662_s24  ;;  %v2161_v36 = vpop.permute.xlu1 %2160  ;;  %v3965_v28 = vrot.slane %v3960_v52, 2  ;;  %v3969_v22 = vmov %v3964_v21  ;;  %v751_v15 = vrot.slane %v244_v6, 1  ;;  %v753_v43 = vrot.slane %v245_v2, 1 }
  0xd9   : > { %v2163_v10 = vunpack.i.h.bf16 %v2161_v36  ;;  %v2162_v9 = vunpack.i.l.bf16 %v2161_v36  ;;  %v1468_v42 = vsel %vm1451_vm8, %v1435_v48, %v2147_v16  ;;  %v1469_v40 = vsel %vm1451_vm8, %v1436_v11, %v2148_v19  ;;  %v3970_v19 = vld [vmem:[#allocation8_spill] sm:$0xff] }
  0xda   : > { %v2156_v63 = vpop.permute.xlu0 %2155  ;;  %2450 = vrot.lane.b32.xlu1 %v3295_v8, %s2663_s25  ;;  %v552_v39 = vsel %vm474_vm1, %v3965_v28, %v3964_v21  ;;  %v554_v26 = vsel %vm474_vm1, %v3969_v22, %v3968_v41  ;;  %v750_v36 = vrot.slane %v243_v29, 1  ;;  %v754_v48 = vsel %vm297_vm0, %v751_v15, %v753_v43  ;;  %v3432_v22 = vld [vmem:[%s2711_s19 + $0xd8] sm:$0xff] }
  0xdb   : > { %v2158_v23 = vunpack.i.h.bf16 %v2156_v63  ;;  %v2157_v25 = vunpack.i.l.bf16 %v2156_v63  ;;  %v1485_v3 = vsel %vm1484_vm9, %v1452_v4, %v2162_v9  ;;  %v1486_v61 = vsel %vm1484_vm9, %v1453_v50, %v2163_v10 }
  0xdc   : > { %2445 = vrot.lane.b32.xlu0 %v3301_v14, %s2663_s25  ;;  %v3356_v32 = vpop.permute.xlu1 %2170  ;;  %v1885_v27 = vpack.c.bf16 %v1486_v61, %v1485_v3  ;;  %v3388_v57 = vpack.i.bf16 %v554_v26, %v552_v39  ;;  %v752_v9 = vsel %vm297_vm0, %v750_v36, %v751_v15  ;;  %v851_v11 = vrot.slane %v243_v29, 2 }
  0xdd   : > { %v1501_v59 = vsel %vm1484_vm9, %v1468_v42, %v2157_v25  ;;  %v1502_v24 = vsel %vm1484_vm9, %v1469_v40, %v2158_v23  ;;  %v1973_v4 = vunpack.i.h.bf16 %v3172_v33  ;;  %v1972_v50 = vunpack.i.l.bf16 %v3172_v33 }
  0xde   : > { %v3378_v52 = vpop.permute.xlu0 %2165  ;;  %2460 = vrot.lane.b32.xlu1 %v3970_v19, %s2664_s26  ;;  %v1882_v16 = vpack.c.bf16 %v1502_v24, %v1501_v59  ;;  %v852_v63 = vrot.slane %v244_v6, 2  ;;  %v854_v23 = vrot.slane %v245_v2, 2  ;;  %v2013_v25 = vunpack.i.h.bf16 %v3191_v62  ;;  %v2604_v24 = vld [vmem:[%s2711_s19 + $0x20] sm:$0xff] }
  0xdf   : > { %v2012_v3 = vunpack.i.l.bf16 %v3191_v62  ;;  %v2053_v42 = vunpack.i.h.bf16 %v3229_v5  ;;  %v2052_v40 = vunpack.i.l.bf16 %v3229_v5  ;;  %v3406_v21 = vpack.i.bf16 %v244_v6, %v243_v29  ;;  %v2605_v29 = vld [vmem:[%s2711_s19 + $0x18] sm:$0xff] }
  0xe0   : > { %2455 = vrot.lane.b32.xlu0 %v2998_v38, %s2664_s26  ;;  %1884 = vmatprep.subr.msk.bf16.mxu0 %vm3369_vm11, %v1882_v16  ;;  %v3386_v49 = vpop.permute.xlu1 %2180  ;;  %v3408_v33 = vpack.i.bf16 %v754_v48, %v752_v9  ;;  %v2093_v2 = vunpack.i.h.bf16 %v3261_v46  ;;  %v2092_v28 = vunpack.i.l.bf16 %v3261_v46  ;;  %v2173_v62 = vunpack.i.h.bf16 %v3356_v32  ;;  %v3427_v46 = vld [vmem:[%s2711_s19 + $0xe0] sm:$0xff] }
  0xe1   : > { %1887 = vmatpush3.bf16.xpose.msk.msra.mxu0 %vm3369_vm11, %v1885_v27  ;;  %v2172_v39 = vunpack.i.l.bf16 %v3356_v32  ;;  %v1257_v5 = vsel %vm1253_vm2, %v2604_v24, %v1973_v4  ;;  %v1256_v6 = vsel %vm1253_vm2, %v2605_v29, %v1972_v50  ;;  %v3421_v27 = vsel %vm474_vm1, %v851_v11, %v852_v63 }
  0xe2   : > { %v3392_v10 = vpop.permute.xlu0 %2175  ;;  %2470 = vrot.lane.b32.xlu1 %v3058_v44, %s2665_s27  ;;  %v3424_v41 = vsel %vm474_vm1, %v852_v63, %v854_v23  ;;  %v1273_v32 = vsel %vm1253_vm2, %v3427_v46, %v2013_v25  ;;  %v2168_v26 = vunpack.i.h.bf16 %v3378_v52  ;;  %v2167_v16 = vunpack.i.l.bf16 %v3378_v52 }
  0xe3   : > { %v1289_v15 = vsel %vm1286_vm3, %v1256_v6, %v2052_v40  ;;  %v1290_v43 = vsel %vm1286_vm3, %v1257_v5, %v2053_v42  ;;  %v2183_v9 = vunpack.i.h.bf16 %v3386_v49  ;;  %v2182_v48 = vunpack.i.l.bf16 %v3386_v49 }
  0xe4   : > { %2465 = vrot.lane.b32.xlu0 %v3388_v57, %s2665_s27  ;;  %v2191_v61 = vpop.permute.xlu1 %2190  ;;  %v1306_v11 = vsel %vm1286_vm3, %v1273_v32, %v2093_v2  ;;  %v1322_v50 = vsel %vm1319_vm4, %v1289_v15, %v2172_v39  ;;  %v1323_v52 = vsel %vm1319_vm4, %v1290_v43, %v2173_v62  ;;  %v2177_v23 = vunpack.i.l.bf16 %v3392_v10 }
  0xe5   : > { %v2193_v25 = vunpack.i.h.bf16 %v2191_v61  ;;  %v1339_v49 = vsel %vm1319_vm4, %v1306_v11, %v2168_v26  ;;  %v1355_v62 = vsel %vm1352_vm5, %v1322_v50, %v2182_v48 }
  0xe6   : > { %v2186_v59 = vpop.permute.xlu0 %2185  ;;  %2480 = vrot.lane.b32.xlu1 %v3301_v14, %s2660_s22  ;;  %v1272_v14 = vsel %vm1253_vm2, %v3432_v22, %v2012_v3  ;;  %v2192_v3 = vunpack.i.l.bf16 %v2191_v61 }
  0xe7   : > { %v1305_v4 = vsel %vm1286_vm3, %v1272_v14, %v2092_v28  ;;  %v2188_v40 = vunpack.i.h.bf16 %v2186_v59  ;;  %v2187_v2 = vunpack.i.l.bf16 %v2186_v59 }
  0xe8   : > { %2475 = vrot.lane.b32.xlu0 %v3276_v35, %s2659_s21  ;;  %v2201_v36 = vpop.permute.xlu1 %2200  ;;  %v2178_v35 = vunpack.i.h.bf16 %v3392_v10  ;;  %v1338_v42 = vsel %vm1319_vm4, %v1305_v4, %v2167_v16 }
  0xe9   : > { %v2203_v39 = vunpack.i.h.bf16 %v2201_v36  ;;  %v2202_v24 = vunpack.i.l.bf16 %v2201_v36  ;;  %v1371_v59 = vsel %vm1352_vm5, %v1338_v42, %v2177_v23 }
  0xea   : > { %v2196_v63 = vpop.permute.xlu0 %2195  ;;  %2490 = vrot.lane.b32.xlu1 %v2998_v38, %s2661_s23  ;;  %v1356_v38 = vsel %vm1352_vm5, %v1323_v52, %v2183_v9  ;;  %v1372_v32 = vsel %vm1352_vm5, %v1339_v49, %v2178_v35  ;;  %v1404_v26 = vsel %vm1385_vm6, %v1371_v59, %v2187_v2  ;;  %v1977_v59 = vunpack.i.l.bf16 %v3157_v12 }
  0xeb   : > { %v2198_v5 = vunpack.i.h.bf16 %v2196_v63  ;;  %v2197_v10 = vunpack.i.l.bf16 %v2196_v63  ;;  %v1389_v14 = vsel %vm1385_vm6, %v1356_v38, %v2193_v25  ;;  %v1405_v16 = vsel %vm1385_vm6, %v1372_v32, %v2188_v40  ;;  %v3500_v32 = vld [vmem:[%s2711_s19 + $0x198] sm:$0xff] }
  0xec   : > { %2485 = vrot.lane.b32.xlu0 %v3295_v8, %s2660_s22  ;;  %v2211_v28 = vpop.permute.xlu1 %2210  ;;  %v1388_v8 = vsel %vm1385_vm6, %v1355_v62, %v2192_v3  ;;  %v1422_v48 = vsel %vm1418_vm7, %v1389_v14, %v2203_v39  ;;  %v2609_v62 = vld [vmem:[%s2711_s19 + $0xc8] sm:$0xff]  ;;  %v2610_v14 = vld [vmem:[%s2711_s19 + $0x38] sm:$0xff] }
  0xed   : > { %v2213_v29 = vunpack.i.h.bf16 %v2211_v28  ;;  %v2212_v61 = vunpack.i.l.bf16 %v2211_v28  ;;  %v1421_v9 = vsel %vm1418_vm7, %v1388_v8, %v2202_v24  ;;  %v1437_v50 = vsel %vm1418_vm7, %v1404_v26, %v2197_v10  ;;  %v2608_v28 = vld [vmem:[%s2711_s19 + $0xc0] sm:$0xff] }
  0xee   : > { %v2206_v6 = vpop.permute.xlu0 %2205  ;;  %2500 = vrot.lane.b32.xlu1 %v3388_v57, %s2662_s24  ;;  %v1438_v52 = vsel %vm1418_vm7, %v1405_v16, %v2198_v5  ;;  %v2514_v38 = vpack.i.bf16 %v2609_v62, %v2608_v28  ;;  %v3503_v8 = vld [vmem:[%s2711_s19 + $0x1a0] sm:$0xff]  ;;  %v2017_v16 = vunpack.i.l.bf16 %v3201_v7  ;;  %v2613_v28 = vld [vmem:[%s2711_s19 + $0xf0] sm:$0xff] }
  0xef   : > { %v2208_v36 = vunpack.i.h.bf16 %v2206_v6  ;;  %v2207_v15 = vunpack.i.l.bf16 %v2206_v6  ;;  %v1454_v63 = vsel %vm1451_vm8, %v1421_v9, %v2212_v61  ;;  %v1455_v35 = vsel %vm1451_vm8, %v1422_v48, %v2213_v29  ;;  %v3520_v9 = vld [vmem:[%s2711_s19 + $0x1a8] sm:$0x3]  ;;  %v2611_v48 = vld [vmem:[%s2711_s19 + $0x30] sm:$0xff] }
  0xf0   : > { %2495 = vrot.lane.b32.xlu0 %v3970_v19, %s2661_s23  ;;  %v2221_v43 = vpop.permute.xlu1 %2220  ;;  %v1978_v61 = vunpack.i.h.bf16 %v3157_v12  ;;  %v2018_v12 = vunpack.i.h.bf16 %v3201_v7  ;;  %v1052_v7 = vrot.slane %v3503_v8, 1 }
  0xf1   : > { %v2223_v11 = vunpack.i.h.bf16 %v2221_v43  ;;  %v2222_v4 = vunpack.i.l.bf16 %v2221_v43  ;;  %v1470_v42 = vsel %vm1451_vm8, %v1437_v50, %v2207_v15  ;;  %v1471_v40 = vsel %vm1451_vm8, %v1438_v52, %v2208_v36  ;;  %v3971_v36 = vld [vmem:[#allocation16_spill] sm:$0xff] }
  0xf2   : > { %v2216_v23 = vpop.permute.xlu0 %2215  ;;  %2510 = vrot.lane.b32.xlu1 %v3406_v21, %s2663_s25  ;;  %v1259_v26 = vsel %vm1253_vm2, %v2610_v14, %v1978_v61  ;;  %v2574_v43 = vpack.i.bf16 %v3503_v8, %v3500_v32  ;;  %v2057_v50 = vunpack.i.l.bf16 %v3238_v18  ;;  %v2098_v52 = vunpack.i.h.bf16 %v3272_v58 }
  0xf3   : > { %v1487_v19 = vsel %vm1484_vm9, %v1454_v63, %v2222_v4  ;;  %v1488_v25 = vsel %vm1484_vm9, %v1455_v35, %v2223_v11  ;;  %v2218_v3 = vunpack.i.h.bf16 %v2216_v23  ;;  %v2217_v49 = vunpack.i.l.bf16 %v2216_v23 }
  0xf4   : > { %2505 = vrot.lane.b32.xlu0 %v3058_v44, %s2662_s24  ;;  %v2231_v2 = vpop.permute.xlu1 %2230  ;;  %v1891_v39 = vpack.c.bf16 %v1488_v25, %v1487_v19  ;;  %v3490_v44 = vpack.i.bf16 %v3424_v41, %v3421_v27  ;;  %v2579_v41 = vpack.i.bf16 %v3427_v46, %v3432_v22  ;;  %v1258_v11 = vsel %vm1253_vm2, %v2611_v48, %v1977_v59 }
  0xf5   : > { %v1503_v24 = vsel %vm1484_vm9, %v1470_v42, %v2217_v49  ;;  %v1504_v5 = vsel %vm1484_vm9, %v1471_v40, %v2218_v3  ;;  %v2058_v4 = vunpack.i.h.bf16 %v3238_v18  ;;  %v2097_v63 = vunpack.i.l.bf16 %v3272_v58  ;;  %v2612_v42 = vld [vmem:[%s2711_s19 + $0xf8] sm:$0xff] }
  0xf6   : > { %v1888_v10 = vpack.c.bf16 %v1504_v5, %v1503_v24  ;;  %v2226_v29 = vpop.permute.xlu0 %2225  ;;  %2520 = vrot.lane.b32.xlu1 %v3408_v33, %s2664_s26  ;;  %v2233_v35 = vunpack.i.h.bf16 %v2231_v2  ;;  %v2232_v23 = vunpack.i.l.bf16 %v2231_v2  ;;  %v1153_v25 = vrot.slane %v3503_v8, 2 }
  0xf7   : > { %v1051_v3 = vrot.slane %v3500_v32, 1  ;;  %v1152_v49 = vrot.slane %v3500_v32, 2  ;;  %v1054_v18 = vrot.slane %v3520_v9, 1  ;;  %v1275_v40 = vsel %vm1253_vm2, %v2612_v42, %v2018_v12 }
  0xf8   : > { %2515 = vrot.lane.b32.xlu0 %v2514_v38, %s2663_s25  ;;  %1890 = vmatprep.subr.msk.bf16.mxu0 %vm3369_vm11, %v1888_v10  ;;  %v2241_v6 = vpop.permute.xlu1 %2240  ;;  %v1274_v58 = vsel %vm1253_vm2, %v2613_v28, %v2017_v16  ;;  %v2228_v62 = vunpack.i.h.bf16 %v2226_v29  ;;  %v2227_v2 = vunpack.i.l.bf16 %v2226_v29  ;;  %v1291_v24 = vsel %vm1286_vm3, %v1258_v11, %v2057_v50 }
  0xf9   : > { %1893 = vmatpush3.bf16.xpose.msk.msra.mxu0 %vm3369_vm11, %v1891_v39  ;;  %v1292_v39 = vsel %vm1286_vm3, %v1259_v26, %v2058_v4  ;;  %v2243_v5 = vunpack.i.h.bf16 %v2241_v6  ;;  %v2242_v10 = vunpack.i.l.bf16 %v2241_v6  ;;  %v1307_v61 = vsel %vm1286_vm3, %v1274_v58, %v2097_v63 }
  0xfa   : > { %v3505_v27 = vpop.permute.xlu0 %2235  ;;  %2530 = vrot.lane.b32.xlu1 %v3490_v44, %s2665_s27  ;;  %v1308_v59 = vsel %vm1286_vm3, %v1275_v40, %v2098_v52  ;;  %v1324_v14 = vsel %vm1319_vm4, %v1291_v24, %v2232_v23  ;;  %v1325_v12 = vsel %vm1319_vm4, %v1292_v39, %v2233_v35  ;;  %v1340_v11 = vsel %vm1319_vm4, %v1307_v61, %v2227_v2 }
  0xfb   : > { %v2238_v29 = vunpack.i.h.bf16 %v3505_v27  ;;  %v2237_v48 = vunpack.i.l.bf16 %v3505_v27  ;;  %v1341_v6 = vsel %vm1319_vm4, %v1308_v59, %v2228_v62  ;;  %v1357_v35 = vsel %vm1352_vm5, %v1324_v14, %v2242_v10 }
  0xfc   : > { %2525 = vrot.lane.b32.xlu0 %v3971_v36, %s2664_s26  ;;  %v2251_v15 = vpop.permute.xlu1 %2250  ;;  %v1154_v46 = vsel %vm474_vm1, %v1152_v49, %v1153_v25  ;;  %v1983_v32 = vunpack.i.h.bf16 %v3168_v31  ;;  %v2023_v8 = vunpack.i.h.bf16 %v3199_v45 }
  0xfd   : > { %v2253_v26 = vunpack.i.h.bf16 %v2251_v15  ;;  %v2252_v4 = vunpack.i.l.bf16 %v2251_v15  ;;  %v1374_v62 = vsel %vm1352_vm5, %v1341_v6, %v2238_v29 }
  0xfe   : > { %v2246_v19 = vpop.permute.xlu0 %2245  ;;  %2540 = vrot.lane.b32.xlu1 %v3388_v57, %s2659_s21 }
  0xff   : > { %v2248_v50 = vunpack.i.h.bf16 %v2246_v19  ;;  %v2247_v63 = vunpack.i.l.bf16 %v2246_v19  ;;  %v1373_v19 = vsel %vm1352_vm5, %v1340_v11, %v2237_v48 }
 0x100   : > { %2535 = vrot.lane.b32.xlu0 %v3087_v53, %s2665_s27  ;;  %v2261_v57 = vpop.permute.xlu1 %2260 }
 0x101   : > { %v2263_v23 = vunpack.i.h.bf16 %v2261_v57  ;;  %v2262_v42 = vunpack.i.l.bf16 %v2261_v57  ;;  %v1406_v39 = vsel %vm1385_vm6, %v1373_v19, %v2247_v63  ;;  %v1407_v57 = vsel %vm1385_vm6, %v1374_v62, %v2248_v50 }
 0x102   : > { %v2256_v16 = vpop.permute.xlu0 %2255  ;;  %2550 = vrot.lane.b32.xlu1 %v2514_v38, %s2660_s22  ;;  %v1358_v38 = vsel %vm1352_vm5, %v1325_v12, %v2243_v5 }
 0x103   : > { %v2258_v40 = vunpack.i.h.bf16 %v2256_v16  ;;  %v2257_v27 = vunpack.i.l.bf16 %v2256_v16  ;;  %v1391_v2 = vsel %vm1385_vm6, %v1358_v38, %v2253_v26 }
 0x104   : > { %2545 = vrot.lane.b32.xlu0 %v3406_v21, %s2660_s22  ;;  %v2271_v52 = vpop.permute.xlu1 %2270  ;;  %v1390_v21 = vsel %vm1385_vm6, %v1357_v35, %v2252_v4  ;;  %v1424_v61 = vsel %vm1418_vm7, %v1391_v2, %v2263_v23  ;;  %v1055_v35 = vsel %vm297_vm0, %v1052_v7, %v1054_v18  ;;  %v2615_v2 = vld [vmem:[%s2711_s19 + $0x48] sm:$0xff] }
 0x105   : > { %v2273_v28 = vunpack.i.h.bf16 %v2271_v52  ;;  %v2272_v15 = vunpack.i.l.bf16 %v2271_v52  ;;  %v1439_v12 = vsel %vm1418_vm7, %v1406_v39, %v2257_v27  ;;  %v1440_v16 = vsel %vm1418_vm7, %v1407_v57, %v2258_v40  ;;  %v2616_v57 = vld [vmem:[%s2711_s19 + $0x110] sm:$0xff] }
 0x106   : > { %v2266_v58 = vpop.permute.xlu0 %2265  ;;  %2560 = vrot.lane.b32.xlu1 %v3971_v36, %s2661_s23  ;;  %v1423_v36 = vsel %vm1418_vm7, %v1390_v21, %v2262_v42 }
 0x107   : > { %v2268_v24 = vunpack.i.h.bf16 %v2266_v58  ;;  %v2267_v5 = vunpack.i.l.bf16 %v2266_v58  ;;  %v1456_v29 = vsel %vm1451_vm8, %v1423_v36, %v2272_v15  ;;  %v1457_v48 = vsel %vm1451_vm8, %v1424_v61, %v2273_v28 }
 0x108   : > { %2555 = vrot.lane.b32.xlu0 %v3408_v33, %s2661_s23  ;;  %v2281_v10 = vpop.permute.xlu1 %2280  ;;  %v2062_v28 = vunpack.i.l.bf16 %v3236_v17  ;;  %v2103_v15 = vunpack.i.h.bf16 %v3268_v60  ;;  %v2102_v58 = vunpack.i.l.bf16 %v3268_v60 }
 0x109   : > { %v2283_v59 = vunpack.i.h.bf16 %v2281_v10  ;;  %v2282_v14 = vunpack.i.l.bf16 %v2281_v10  ;;  %v1472_v50 = vsel %vm1451_vm8, %v1439_v12, %v2267_v5  ;;  %v1473_v63 = vsel %vm1451_vm8, %v1440_v16, %v2268_v24 }
 0x10a   : > { %v2276_v26 = vpop.permute.xlu0 %2275  ;;  %2570 = vrot.lane.b32.xlu1 %v3087_v53, %s2662_s24  ;;  %v1053_v53 = vsel %vm297_vm0, %v1051_v3, %v1052_v7  ;;  %v1277_v24 = vsel %vm1253_vm2, %v2616_v57, %v2023_v8 }
 0x10b   : > { %v1489_v33 = vsel %vm1484_vm9, %v1456_v29, %v2282_v14  ;;  %v1490_v4 = vsel %vm1484_vm9, %v1457_v48, %v2283_v59  ;;  %v2278_v11 = vunpack.i.h.bf16 %v2276_v26  ;;  %v2277_v6 = vunpack.i.l.bf16 %v2276_v26 }
 0x10c   : > { %2565 = vrot.lane.b32.xlu0 %v3490_v44, %s2662_s24  ;;  %v2291_v52 = vpop.permute.xlu1 %2290  ;;  %v1897_v38 = vpack.c.bf16 %v1490_v4, %v1489_v33  ;;  %v1155_v44 = vrot.slane %v3520_v9, 2  ;;  %v2584_v3 = vpack.i.bf16 %v1055_v35, %v1053_v53  ;;  %v1982_v9 = vunpack.i.l.bf16 %v3168_v31 }
 0x10d   : > { %v1505_v23 = vsel %vm1484_vm9, %v1472_v50, %v2277_v6  ;;  %v1506_v42 = vsel %vm1484_vm9, %v1473_v63, %v2278_v11  ;;  %v2293_v31 = vunpack.i.h.bf16 %v2291_v52  ;;  %v2292_v19 = vunpack.i.l.bf16 %v2291_v52 }
 0x10e   : > { %v1894_v40 = vpack.c.bf16 %v1506_v42, %v1505_v23  ;;  %v2286_v27 = vpop.permute.xlu0 %2285  ;;  %2580 = vrot.lane.b32.xlu1 %v2579_v41, %s2663_s25  ;;  %v1156_v22 = vsel %vm474_vm1, %v1153_v25, %v1155_v44  ;;  %v3616_v41 = vld [vmem:[%s3897_s1] sm:$0xff]  ;;  %v2022_v25 = vunpack.i.l.bf16 %v3199_v45  ;;  %v2614_v45 = vld [vmem:[%s2711_s19 + $0x50] sm:$0xff]  ;;  %v1260_v39 = vsel %vm1253_vm2, %v2615_v2, %v1982_v9 }
 0x10f   : > { %1880 = vmatprep.mubr.msk.f32.mxu0 %vm1518_vm10, %v3616_v41  ;;  %v2594_v18 = vpack.i.bf16 %v1156_v22, %v1154_v46  ;;  %v1261_v21 = vsel %vm1253_vm2, %v2614_v45, %v1983_v32  ;;  %v2288_v10 = vunpack.i.h.bf16 %v2286_v27  ;;  %v2287_v60 = vunpack.i.l.bf16 %v2286_v27 }
 0x110   : > { %2575 = vrot.lane.b32.xlu0 %v2574_v43, %s2663_s25  ;;  %1896 = vmatprep.subr.msk.bf16.mxu0 %vm3369_vm11, %v1894_v40  ;;  %v2301_v7 = vpop.permute.xlu1 %2300  ;;  %v1310_v12 = vsel %vm1286_vm3, %v1277_v24, %v2103_v15 }
 0x111   : > { %1899 = vmatpush3.bf16.xpose.msk.msra.mxu0 %vm3369_vm11, %v1897_v38  ;;  %v2303_v59 = vunpack.i.h.bf16 %v2301_v7  ;;  %v2302_v14 = vunpack.i.l.bf16 %v2301_v7  ;;  %v1343_v50 = vsel %vm1319_vm4, %v1310_v12, %v2288_v10 }
 0x112   : > { %v2296_v43 = vpop.permute.xlu0 %2295  ;;  %2590 = vrot.lane.b32.xlu1 %v2912_v20, %s2664_s26  ;;  %v2063_v20 = vunpack.i.h.bf16 %v3236_v17  ;;  %v2617_v17 = vld [vmem:[%s2711_s19 + $0x108] sm:$0xff] }
 0x113   : > { %v1276_v5 = vsel %vm1253_vm2, %v2617_v17, %v2022_v25  ;;  %v2298_v33 = vunpack.i.h.bf16 %v2296_v43  ;;  %v2297_v4 = vunpack.i.l.bf16 %v2296_v43 }
 0x114   : > { %2585 = vrot.lane.b32.xlu0 %v2584_v3, %s2664_s26  ;;  %v2311_v49 = vpop.permute.xlu1 %2310  ;;  %v1294_v61 = vsel %vm1286_vm3, %v1261_v21, %v2063_v20  ;;  %v1309_v16 = vsel %vm1286_vm3, %v1276_v5, %v2102_v58 }
 0x115   : > { %v1327_v29 = vsel %vm1319_vm4, %v1294_v61, %v2293_v31  ;;  %v2313_v11 = vunpack.i.h.bf16 %v2311_v49  ;;  %v2312_v6 = vunpack.i.l.bf16 %v2311_v49  ;;  %v1342_v63 = vsel %vm1319_vm4, %v1309_v16, %v2287_v60 }
 0x116   : > { %v2306_v62 = vpop.permute.xlu0 %2305  ;;  %2600 = vrot.lane.b32.xlu1 %v3081_v13, %s2665_s27  ;;  %v1293_v13 = vsel %vm1286_vm3, %v1260_v39, %v2062_v28  ;;  %v1360_v23 = vsel %vm1352_vm5, %v1327_v29, %v2303_v59  ;;  %v1375_v22 = vsel %vm1352_vm5, %v1342_v63, %v2297_v4  ;;  %v1376_v43 = vsel %vm1352_vm5, %v1343_v50, %v2298_v33 }
 0x117   : > { %v1326_v48 = vsel %vm1319_vm4, %v1293_v13, %v2292_v19  ;;  %v2308_v52 = vunpack.i.h.bf16 %v2306_v62  ;;  %v2307_v53 = vunpack.i.l.bf16 %v2306_v62  ;;  %v1393_v9 = vsel %vm1385_vm6, %v1360_v23, %v2313_v11  ;;  %v2619_v23 = vld [vmem:[%s2711_s19 + $0x128] sm:$0xff] }
 0x118   : > { %2595 = vrot.lane.b32.xlu0 %v2594_v18, %s2665_s27  ;;  %v2321_v36 = vpop.permute.xlu1 %2320  ;;  %v1359_v38 = vsel %vm1352_vm5, %v1326_v48, %v2302_v14  ;;  %v2027_v48 = vunpack.i.l.bf16 %v3215_v55  ;;  %v1987_v50 = vunpack.i.l.bf16 %v3180_v37 }
 0x119   : > { %v2323_v42 = vunpack.i.h.bf16 %v2321_v36  ;;  %v2322_v44 = vunpack.i.l.bf16 %v2321_v36  ;;  %v1392_v32 = vsel %vm1385_vm6, %v1359_v38, %v2312_v6  ;;  %v1408_v8 = vsel %vm1385_vm6, %v1375_v22, %v2307_v53  ;;  %v2620_v22 = vld [vmem:[%s2711_s19 + $0x68] sm:$0xff] }
 0x11a   : > { %v2316_v26 = vpop.permute.xlu0 %2315  ;;  %v1409_v25 = vsel %vm1385_vm6, %v1376_v43, %v2308_v52  ;;  %v1988_v6 = vunpack.i.h.bf16 %v3180_v37  ;;  %v2618_v52 = vld [vmem:[%s2711_s19 + $0x120] sm:$0xff]  ;;  %v2067_v38 = vunpack.i.l.bf16 %v3244_v0 }
 0x11b   : > { %v2318_v40 = vunpack.i.h.bf16 %v2316_v26  ;;  %v2317_v27 = vunpack.i.l.bf16 %v2316_v26  ;;  %v1425_v28 = vsel %vm1418_vm7, %v1392_v32, %v2322_v44  ;;  %v1426_v15 = vsel %vm1418_vm7, %v1393_v9, %v2323_v42  ;;  %v2621_v32 = vld [vmem:[%s2711_s19 + $0x60] sm:$0xff] }
 0x11c   : > { %v2331_v35 = vpop.permute.xlu1 %2330  ;;  %v2028_v26 = vunpack.i.h.bf16 %v3215_v55  ;;  %v1278_v53 = vsel %vm1253_vm2, %v2618_v52, %v2027_v48  ;;  %v1263_v43 = vsel %vm1253_vm2, %v2620_v22, %v1988_v6 }
 0x11d   : > { %v2333_v7 = vunpack.i.h.bf16 %v2331_v35  ;;  %v2332_v3 = vunpack.i.l.bf16 %v2331_v35  ;;  %v1441_v19 = vsel %vm1418_vm7, %v1408_v8, %v2317_v27  ;;  %v1442_v62 = vsel %vm1418_vm7, %v1409_v25, %v2318_v40 }
 0x11e   : > { %v2326_v46 = vpop.permute.xlu0 %2325  ;;  %v2068_v35 = vunpack.i.h.bf16 %v3244_v0  ;;  %v1279_v55 = vsel %vm1253_vm2, %v2619_v23, %v2028_v26  ;;  %v1262_v0 = vsel %vm1253_vm2, %v2621_v32, %v1987_v50 }
 0x11f   : > { %v2328_v49 = vunpack.i.h.bf16 %v2326_v46  ;;  %v2327_v18 = vunpack.i.l.bf16 %v2326_v46  ;;  %v1458_v45 = vsel %vm1451_vm8, %v1425_v28, %v2332_v3  ;;  %v1459_v21 = vsel %vm1451_vm8, %v1426_v15, %v2333_v7 }
 0x120   : > { %v2341_v20 = vpop.permute.xlu1 %2340 }
 0x121   : > { %v2343_v58 = vunpack.i.h.bf16 %v2341_v20  ;;  %v2342_v31 = vunpack.i.l.bf16 %v2341_v20  ;;  %v1474_v5 = vsel %vm1451_vm8, %v1441_v19, %v2327_v18  ;;  %v1475_v10 = vsel %vm1451_vm8, %v1442_v62, %v2328_v49 }
 0x122   : > { %v2336_v2 = vpop.permute.xlu0 %2335  ;;  %v1295_v49 = vsel %vm1286_vm3, %v1262_v0, %v2067_v38  ;;  %v1296_v18 = vsel %vm1286_vm3, %v1263_v43, %v2068_v35 }
 0x123   : > { %v1491_v39 = vsel %vm1484_vm9, %v1458_v45, %v2342_v31  ;;  %v1492_v57 = vsel %vm1484_vm9, %v1459_v21, %v2343_v58  ;;  %v2338_v24 = vunpack.i.h.bf16 %v2336_v2  ;;  %v2337_v17 = vunpack.i.l.bf16 %v2336_v2 }
 0x124   : > { %v2351_v60 = vpop.permute.xlu1 %2350  ;;  %v1903_v36 = vpack.c.bf16 %v1492_v57, %v1491_v39 }
 0x125   : > { %v1507_v61 = vsel %vm1484_vm9, %v1474_v5, %v2337_v17  ;;  %v1508_v13 = vsel %vm1484_vm9, %v1475_v10, %v2338_v24  ;;  %v2353_v42 = vunpack.i.h.bf16 %v2351_v60  ;;  %v2352_v44 = vunpack.i.l.bf16 %v2351_v60 }
 0x126   : > { %v1900_v59 = vpack.c.bf16 %v1508_v13, %v1507_v61  ;;  %v2346_v14 = vpop.permute.xlu0 %2345 }
 0x127   : > { %v2347_v33 = vunpack.i.l.bf16 %v2346_v14  ;;  %v2348_v11 = vunpack.i.h.bf16 %v2346_v14 }
 0x128   : > { %1902 = vmatprep.subr.msk.bf16.mxu0 %vm3369_vm11, %v1900_v59  ;;  %v2361_v12 = vpop.permute.xlu1 %2360 }
 0x129   : > { %1905 = vmatpush3.bf16.xpose.msk.msra.mxu0 %vm3369_vm11, %v1903_v36  ;;  %v1311_v40 = vsel %vm1286_vm3, %v1278_v53, %v2347_v33  ;;  %v1312_v37 = vsel %vm1286_vm3, %v1279_v55, %v2348_v11  ;;  %v2363_v7 = vunpack.i.h.bf16 %v2361_v12  ;;  %v2362_v3 = vunpack.i.l.bf16 %v2361_v12 }
 0x12a   : > { %v3674_v16 = vpop.permute.xlu0 %2355  ;;  %v1344_v15 = vsel %vm1319_vm4, %v1311_v40, %v2352_v44  ;;  %v1345_v58 = vsel %vm1319_vm4, %v1312_v37, %v2353_v42 }
 0x12b   : > { %v2357_v46 = vunpack.i.l.bf16 %v3674_v16  ;;  %v1377_v45 = vsel %vm1352_vm5, %v1344_v15, %v2362_v3  ;;  %v1378_v21 = vsel %vm1352_vm5, %v1345_v58, %v2363_v7  ;;  %v2358_v2 = vunpack.i.h.bf16 %v3674_v16 }
 0x12c   : > { %v2371_v29 = vpop.permute.xlu1 %2370  ;;  %v2072_v15 = vunpack.i.l.bf16 %v3242_v51 }
 0x12d   : > { %v2373_v9 = vunpack.i.h.bf16 %v2371_v29  ;;  %v2372_v8 = vunpack.i.l.bf16 %v2371_v29  ;;  %v1328_v39 = vsel %vm1319_vm4, %v1295_v49, %v2357_v46  ;;  %v1329_v11 = vsel %vm1319_vm4, %v1296_v18, %v2358_v2 }
 0x12e   : > { %v3678_v4 = vpop.permute.xlu0 %2365  ;;  %v2033_v49 = vunpack.i.h.bf16 %v3208_v47  ;;  %v2032_v18 = vunpack.i.l.bf16 %v3208_v47  ;;  %v2625_v47 = vld [vmem:[%s2711_s19 + $0x138] sm:$0xff] }
 0x12f   : > { %v1410_v57 = vsel %vm1385_vm6, %v1377_v45, %v2372_v8  ;;  %v1411_v24 = vsel %vm1385_vm6, %v1378_v21, %v2373_v9  ;;  %v2368_v17 = vunpack.i.h.bf16 %v3678_v4  ;;  %v2367_v5 = vunpack.i.l.bf16 %v3678_v4  ;;  %v2622_v21 = vld [vmem:[%s2711_s19 + $0x80] sm:$0xff] }
 0x130   : > { %v2381_v63 = vpop.permute.xlu1 %2380  ;;  %v1993_v8 = vunpack.i.h.bf16 %v3178_v34 }
 0x131   : > { %v2383_v20 = vunpack.i.h.bf16 %v2381_v63  ;;  %v2382_v28 = vunpack.i.l.bf16 %v2381_v63  ;;  %v1361_v53 = vsel %vm1352_vm5, %v1328_v39, %v2367_v5  ;;  %v1362_v35 = vsel %vm1352_vm5, %v1329_v11, %v2368_v17  ;;  %v2623_v39 = vld [vmem:[%s2711_s19 + $0x78] sm:$0xff] }
 0x132   : > { %v2376_v27 = vpop.permute.xlu0 %2375  ;;  %v1265_v2 = vsel %vm1253_vm2, %v2622_v21, %v1993_v8  ;;  %v1280_v17 = vsel %vm1253_vm2, %v2625_v47, %v2032_v18 }
 0x133   : > { %v1443_v60 = vsel %vm1418_vm7, %v1410_v57, %v2382_v28  ;;  %v1444_v36 = vsel %vm1418_vm7, %v1411_v24, %v2383_v20  ;;  %v2378_v59 = vunpack.i.h.bf16 %v2376_v27  ;;  %v2377_v14 = vunpack.i.l.bf16 %v2376_v27  ;;  %v2624_v57 = vld [vmem:[%s2711_s19 + $0x140] sm:$0xff] }
 0x134   : > { %v2391_v25 = vpop.permute.xlu1 %2390  ;;  %v2073_v28 = vunpack.i.h.bf16 %v3242_v51  ;;  %v1281_v24 = vsel %vm1253_vm2, %v2624_v57, %v2033_v49 }
 0x135   : > { %v2393_v31 = vunpack.i.h.bf16 %v2391_v25  ;;  %v2392_v19 = vunpack.i.l.bf16 %v2391_v25  ;;  %v1394_v38 = vsel %vm1385_vm6, %v1361_v53, %v2377_v14  ;;  %v1395_v23 = vsel %vm1385_vm6, %v1362_v35, %v2378_v59 }
 0x136   : > { %v2386_v62 = vpop.permute.xlu0 %2385  ;;  %v1992_v25 = vunpack.i.l.bf16 %v3178_v34 }
 0x137   : > { %v1476_v12 = vsel %vm1451_vm8, %v1443_v60, %v2392_v19  ;;  %v1477_v16 = vsel %vm1451_vm8, %v1444_v36, %v2393_v31  ;;  %v2388_v48 = vunpack.i.h.bf16 %v2386_v62  ;;  %v2387_v26 = vunpack.i.l.bf16 %v2386_v62 }
 0x138   : > { %v2401_v10 = vpop.permute.xlu1 %2400  ;;  %v1264_v34 = vsel %vm1253_vm2, %v2623_v39, %v1992_v25  ;;  %v1298_v60 = vsel %vm1286_vm3, %v1265_v2, %v2073_v28 }
 0x139   : > { %v2403_v61 = vunpack.i.h.bf16 %v2401_v10  ;;  %v2402_v13 = vunpack.i.l.bf16 %v2401_v10  ;;  %v1427_v42 = vsel %vm1418_vm7, %v1394_v38, %v2387_v26  ;;  %v1428_v44 = vsel %vm1418_vm7, %v1395_v23, %v2388_v48 }
 0x13a   : > { %v2396_v29 = vpop.permute.xlu0 %2395  ;;  %v1297_v36 = vsel %vm1286_vm3, %v1264_v34, %v2072_v15 }
 0x13b   : > { %v1509_v33 = vsel %vm1484_vm9, %v1476_v12, %v2402_v13  ;;  %v1510_v4 = vsel %vm1484_vm9, %v1477_v16, %v2403_v61  ;;  %v2398_v50 = vunpack.i.h.bf16 %v2396_v29  ;;  %v2397_v63 = vunpack.i.l.bf16 %v2396_v29 }
 0x13c   : > { %v1906_v6 = vpack.c.bf16 %v1510_v4, %v1509_v33  ;;  %v2411_v52 = vpop.permute.xlu1 %2410 }
 0x13d   : > { %v1460_v37 = vsel %vm1451_vm8, %v1427_v42, %v2397_v63  ;;  %v1461_v7 = vsel %vm1451_vm8, %v1428_v44, %v2398_v50  ;;  %v2413_v58 = vunpack.i.h.bf16 %v2411_v52  ;;  %v2412_v31 = vunpack.i.l.bf16 %v2411_v52 }
 0x13e   : > { %v2406_v55 = vpop.permute.xlu0 %2405  ;;  %1908 = vmatprep.subr.msk.bf16.mxu0 %vm3369_vm11, %v1906_v6 }
 0x13f   : > { %v2408_v40 = vunpack.i.h.bf16 %v2406_v55  ;;  %v2407_v27 = vunpack.i.l.bf16 %v2406_v55  ;;  %v1314_v59 = vsel %vm1286_vm3, %v1281_v24, %v2413_v58  ;;  %v1313_v14 = vsel %vm1286_vm3, %v1280_v17, %v2412_v31 }
 0x140   : > { %v2421_v3 = vpop.permute.xlu1 %2420 }
 0x141   : > { %v1493_v46 = vsel %vm1484_vm9, %v1460_v37, %v2407_v27  ;;  %v1494_v22 = vsel %vm1484_vm9, %v1461_v7, %v2408_v40  ;;  %v2423_v19 = vunpack.i.h.bf16 %v2421_v3  ;;  %v2422_v62 = vunpack.i.l.bf16 %v2421_v3 }
 0x142   : > { %v1909_v43 = vpack.c.bf16 %v1494_v22, %v1493_v46  ;;  %v2416_v32 = vpop.permute.xlu0 %2415 }
 0x143   : > { %v2418_v5 = vunpack.i.h.bf16 %v2416_v32  ;;  %v2417_v10 = vunpack.i.l.bf16 %v2416_v32  ;;  %v1331_v12 = vsel %vm1319_vm4, %v1298_v60, %v2423_v19  ;;  %v1330_v16 = vsel %vm1319_vm4, %v1297_v36, %v2422_v62 }
 0x144   : > { %1911 = vmatpush3.bf16.xpose.msk.msra.mxu0 %vm3369_vm11, %v1909_v43  ;;  %v2431_v0 = vpop.permute.xlu1 %2430  ;;  %v2037_v36 = vunpack.i.l.bf16 %v3223_v54 }
 0x145   : > { %v2433_v61 = vunpack.i.h.bf16 %v2431_v0  ;;  %v2432_v13 = vunpack.i.l.bf16 %v2431_v0  ;;  %v1347_v11 = vsel %vm1319_vm4, %v1314_v59, %v2418_v5  ;;  %v1346_v6 = vsel %vm1319_vm4, %v1313_v14, %v2417_v10 }
 0x146   : > { %v2426_v9 = vpop.permute.xlu0 %2425 }
 0x147   : > { %v2428_v48 = vunpack.i.h.bf16 %v2426_v9  ;;  %v2427_v26 = vunpack.i.l.bf16 %v2426_v9  ;;  %v1363_v53 = vsel %vm1352_vm5, %v1330_v16, %v2432_v13  ;;  %v1364_v35 = vsel %vm1352_vm5, %v1331_v12, %v2433_v61 }
 0x148   : > { %v2441_v20 = vpop.permute.xlu1 %2440  ;;  %v2038_v61 = vunpack.i.h.bf16 %v3223_v54  ;;  %v1998_v12 = vunpack.i.h.bf16 %v3187_v30  ;;  %v1997_v16 = vunpack.i.l.bf16 %v3187_v30 }
 0x149   : > { %v2443_v33 = vunpack.i.h.bf16 %v2441_v20  ;;  %v2442_v4 = vunpack.i.l.bf16 %v2441_v20  ;;  %v1379_v37 = vsel %vm1352_vm5, %v1346_v6, %v2427_v26  ;;  %v1380_v7 = vsel %vm1352_vm5, %v1347_v11, %v2428_v48  ;;  %v2626_v48 = vld [vmem:[%s2711_s19 + $0x150] sm:$0xff]  ;;  %v2627_v11 = vld [vmem:[%s2711_s19 + $0x158] sm:$0xff] }
 0x14a   : > { %v2436_v45 = vpop.permute.xlu0 %2435  ;;  %v1282_v26 = vsel %vm1253_vm2, %v2626_v48, %v2037_v36  ;;  %v1283_v54 = vsel %vm1253_vm2, %v2627_v11, %v2038_v61 }
 0x14b   : > { %v2438_v50 = vunpack.i.h.bf16 %v2436_v45  ;;  %v2437_v63 = vunpack.i.l.bf16 %v2436_v45  ;;  %v1396_v3 = vsel %vm1385_vm6, %v1363_v53, %v2442_v4  ;;  %v1397_v46 = vsel %vm1385_vm6, %v1364_v35, %v2443_v33 }
 0x14c   : > { %v2451_v51 = vpop.permute.xlu1 %2450  ;;  %v2078_v33 = vunpack.i.h.bf16 %v3251_v56  ;;  %v2077_v4 = vunpack.i.l.bf16 %v3251_v56 }
 0x14d   : > { %v2453_v38 = vunpack.i.h.bf16 %v2451_v51  ;;  %v2452_v23 = vunpack.i.l.bf16 %v2451_v51  ;;  %v1412_v22 = vsel %vm1385_vm6, %v1379_v37, %v2437_v63  ;;  %v1413_v43 = vsel %vm1385_vm6, %v1380_v7, %v2438_v50 }
 0x14e   : > { %v2446_v29 = vpop.permute.xlu0 %2445 }
 0x14f   : > { %v2448_v55 = vunpack.i.h.bf16 %v2446_v29  ;;  %v2447_v42 = vunpack.i.l.bf16 %v2446_v29  ;;  %v1429_v8 = vsel %vm1418_vm7, %v1396_v3, %v2452_v23  ;;  %v1430_v25 = vsel %vm1418_vm7, %v1397_v46, %v2453_v38  ;;  %v2628_v23 = vld [vmem:[%s2711_s19 + $0x98] sm:$0xff] }
 0x150   : > { %v2461_v52 = vpop.permute.xlu1 %2460 }
 0x151   : > { %v2463_v44 = vunpack.i.h.bf16 %v2461_v52  ;;  %v2462_v40 = vunpack.i.l.bf16 %v2461_v52  ;;  %v1445_v20 = vsel %vm1418_vm7, %v1412_v22, %v2447_v42  ;;  %v1446_v28 = vsel %vm1418_vm7, %v1413_v43, %v2448_v55  ;;  %v2629_v42 = vld [vmem:[%s2711_s19 + $0x90] sm:$0xff] }
 0x152   : > { %v2456_v27 = vpop.permute.xlu0 %2455  ;;  %v1267_v55 = vsel %vm1253_vm2, %v2628_v23, %v1998_v12  ;;  %v1266_v56 = vsel %vm1253_vm2, %v2629_v42, %v1997_v16  ;;  %v3973_v42 = vld [vmem:[#allocation5_spill] sm:$0xff] }
 0x153   : > { %v2458_v32 = vunpack.i.h.bf16 %v2456_v27  ;;  %v2457_v0 = vunpack.i.l.bf16 %v2456_v27  ;;  %v1462_v15 = vsel %vm1451_vm8, %v1429_v8, %v2462_v40  ;;  %v1463_v58 = vsel %vm1451_vm8, %v1430_v25, %v2463_v44 }
 0x154   : > { %v2471_v9 = vpop.permute.xlu1 %2470  ;;  %v1299_v37 = vsel %vm1286_vm3, %v1266_v56, %v2077_v4  ;;  %v1300_v7 = vsel %vm1286_vm3, %v1267_v55, %v2078_v33  ;;  %v2043_v56 = vunpack.i.h.bf16 %v3973_v42 }
 0x155   : > { %v2473_v49 = vunpack.i.h.bf16 %v2471_v9  ;;  %v2472_v18 = vunpack.i.l.bf16 %v2471_v9  ;;  %v1478_v2 = vsel %vm1451_vm8, %v1445_v20, %v2457_v0  ;;  %v1479_v39 = vsel %vm1451_vm8, %v1446_v28, %v2458_v32 }
 0x156   : > { %v2466_v31 = vpop.permute.xlu0 %2465 }
 0x157   : > { %v1495_v19 = vsel %vm1484_vm9, %v1462_v15, %v2472_v18  ;;  %v1496_v62 = vsel %vm1484_vm9, %v1463_v58, %v2473_v49  ;;  %v2468_v45 = vunpack.i.h.bf16 %v2466_v31  ;;  %v2467_v21 = vunpack.i.l.bf16 %v2466_v31 }
 0x158   : > { %v2481_v34 = vpop.permute.xlu1 %2480  ;;  %v1915_v57 = vpack.c.bf16 %v1496_v62, %v1495_v19 }
 0x159   : > { %v1511_v24 = vsel %vm1484_vm9, %v1478_v2, %v2467_v21  ;;  %v1512_v47 = vsel %vm1484_vm9, %v1479_v39, %v2468_v45  ;;  %v2483_v6 = vunpack.i.h.bf16 %v2481_v34  ;;  %v2482_v50 = vunpack.i.l.bf16 %v2481_v34 }
 0x15a   : > { %v1912_v17 = vpack.c.bf16 %v1512_v47, %v1511_v24  ;;  %v2476_v5 = vpop.permute.xlu0 %2475 }
 0x15b   : > { %v2477_v13 = vunpack.i.l.bf16 %v2476_v5  ;;  %v2478_v14 = vunpack.i.h.bf16 %v2476_v5 }
 0x15c   : > { %1914 = vmatprep.subr.msk.bf16.mxu0 %vm3369_vm11, %v1912_v17  ;;  %v2491_v10 = vpop.permute.xlu1 %2490 }
 0x15d   : > { %1917 = vmatpush3.bf16.xpose.msk.msra.mxu0 %vm3369_vm11, %v1915_v57  ;;  %v1315_v63 = vsel %vm1286_vm3, %v1282_v26, %v2477_v13  ;;  %v1316_v30 = vsel %vm1286_vm3, %v1283_v54, %v2478_v14  ;;  %v2493_v53 = vunpack.i.h.bf16 %v2491_v10  ;;  %v2492_v35 = vunpack.i.l.bf16 %v2491_v10 }
 0x15e   : > { %v3774_v51 = vpop.permute.xlu0 %2485  ;;  %v1348_v22 = vsel %vm1319_vm4, %v1315_v63, %v2482_v50  ;;  %v1349_v43 = vsel %vm1319_vm4, %v1316_v30, %v2483_v6 }
 0x15f   : > { %v2487_v38 = vunpack.i.l.bf16 %v3774_v51  ;;  %v1381_v8 = vsel %vm1352_vm5, %v1348_v22, %v2492_v35  ;;  %v1382_v25 = vsel %vm1352_vm5, %v1349_v43, %v2493_v53  ;;  %v2488_v49 = vunpack.i.h.bf16 %v3774_v51 }
 0x160   : > { %v2501_v60 = vpop.permute.xlu1 %2500 }
 0x161   : > { %v2503_v44 = vunpack.i.h.bf16 %v2501_v60  ;;  %v2502_v40 = vunpack.i.l.bf16 %v2501_v60  ;;  %v1332_v18 = vsel %vm1319_vm4, %v1299_v37, %v2487_v38  ;;  %v1333_v51 = vsel %vm1319_vm4, %v1300_v7, %v2488_v49  ;;  %v3972_v38 = vld [vmem:[#allocation4_spill] sm:$0xff] }
 0x162   : > { %v3778_v59 = vpop.permute.xlu0 %2495  ;;  %v2003_v23 = vunpack.i.h.bf16 %v3972_v38  ;;  %v2002_v55 = vunpack.i.l.bf16 %v3972_v38  ;;  %v2632_v49 = vld [vmem:[%s2711_s19 + $0x170] sm:$0xff] }
 0x163   : > { %v1414_v20 = vsel %vm1385_vm6, %v1381_v8, %v2502_v40  ;;  %v1415_v28 = vsel %vm1385_vm6, %v1382_v25, %v2503_v44  ;;  %v2498_v15 = vunpack.i.h.bf16 %v3778_v59  ;;  %v2497_v58 = vunpack.i.l.bf16 %v3778_v59  ;;  %v2631_v8 = vld [vmem:[%s2711_s19 + $0xa8] sm:$0xff] }
 0x164   : > { %v2511_v29 = vpop.permute.xlu1 %2510  ;;  %v2042_v44 = vunpack.i.l.bf16 %v3973_v42  ;;  %v1268_v25 = vsel %vm1253_vm2, %v2631_v8, %v2002_v55 }
 0x165   : > { %v2513_v3 = vunpack.i.h.bf16 %v2511_v29  ;;  %v2512_v46 = vunpack.i.l.bf16 %v2511_v29  ;;  %v1365_v59 = vsel %vm1352_vm5, %v1332_v18, %v2497_v58  ;;  %v1366_v14 = vsel %vm1352_vm5, %v1333_v51, %v2498_v15 }
 0x166   : > { %v2506_v52 = vpop.permute.xlu0 %2505  ;;  %v1285_v18 = vsel %vm1253_vm2, %v2632_v49, %v2043_v56  ;;  %v2666_v49 = vmov 0.0  }
 0x167   : > { %v1447_v19 = vsel %vm1418_vm7, %v1414_v20, %v2512_v46  ;;  %v1448_v62 = vsel %vm1418_vm7, %v1415_v28, %v2513_v3  ;;  %v2508_v2 = vunpack.i.h.bf16 %v2506_v52  ;;  %v2507_v39 = vunpack.i.l.bf16 %v2506_v52  ;;  %v2633_v20 = vld [vmem:[%s2711_s19 + $0x168] sm:$0xff]  ;;  %1694 = vst.msk [vmem:[%s187_s6] sm:$0xff] %vm1693_vm12, %v2666_v49  ;;  %1695 = vst.msk [vmem:[%s191_s9] sm:$0xff] %vm1693_vm12, %v2666_v49 }
 0x168   : > { %v2521_v27 = vpop.permute.xlu1 %2520  ;;  %v1284_v28 = vsel %vm1253_vm2, %v2633_v20, %v2042_v44 }
 0x169   : > { %v2523_v32 = vunpack.i.h.bf16 %v2521_v27  ;;  %v2522_v0 = vunpack.i.l.bf16 %v2521_v27  ;;  %v1398_v12 = vsel %vm1385_vm6, %v1365_v59, %v2507_v39  ;;  %v1399_v16 = vsel %vm1385_vm6, %v1366_v14, %v2508_v2  ;;  %v3974_v27 = vld [vmem:[#allocation13_spill] sm:$0xff] }
 0x16a   : > { %v2516_v9 = vpop.permute.xlu0 %2515  ;;  %v2083_v37 = vunpack.i.h.bf16 %v3974_v27  ;;  %v2082_v7 = vunpack.i.l.bf16 %v3974_v27 }
 0x16b   : > { %v1480_v34 = vsel %vm1451_vm8, %v1447_v19, %v2522_v0  ;;  %v1481_v57 = vsel %vm1451_vm8, %v1448_v62, %v2523_v32  ;;  %v2518_v47 = vunpack.i.h.bf16 %v2516_v9  ;;  %v2517_v17 = vunpack.i.l.bf16 %v2516_v9  ;;  %v2630_v0 = vld [vmem:[%s2711_s19 + $0xb0] sm:$0xff] }
 0x16c   : > { %v2531_v31 = vpop.permute.xlu1 %2530  ;;  %v1269_v9 = vsel %vm1253_vm2, %v2630_v0, %v2003_v23  ;;  %v1301_v62 = vsel %vm1286_vm3, %v1268_v25, %v2082_v7 }
 0x16d   : > { %v2533_v45 = vunpack.i.h.bf16 %v2531_v31  ;;  %v2532_v21 = vunpack.i.l.bf16 %v2531_v31  ;;  %v1431_v48 = vsel %vm1418_vm7, %v1398_v12, %v2517_v17  ;;  %v1432_v26 = vsel %vm1418_vm7, %v1399_v16, %v2518_v47 }
 0x16e   : > { %v2526_v24 = vpop.permute.xlu0 %2525  ;;  %v1302_v19 = vsel %vm1286_vm3, %v1269_v9, %v2083_v37  ;;  %v1696_v1 = vld [vmem:[%s187_s6] sm:$0xff] }
 0x16f   : > { %v1513_v5 = vsel %vm1484_vm9, %v1480_v34, %v2532_v21  ;;  %v1514_v10 = vsel %vm1484_vm9, %v1481_v57, %v2533_v45  ;;  %v2528_v36 = vunpack.i.h.bf16 %v2526_v24  ;;  %v2527_v61 = vunpack.i.l.bf16 %v2526_v24 }
 0x170   : > { %v1918_v60 = vpack.c.bf16 %v1514_v10, %v1513_v5  ;;  %v2541_v13 = vpop.permute.xlu1 %2540 }
 0x171   : > { %v1464_v11 = vsel %vm1451_vm8, %v1431_v48, %v2527_v61  ;;  %v1465_v54 = vsel %vm1451_vm8, %v1432_v26, %v2528_v36  ;;  %v2543_v3 = vunpack.i.h.bf16 %v2541_v13  ;;  %v2542_v46 = vunpack.i.l.bf16 %v2541_v13 }
 0x172   : > { %v2536_v29 = vpop.permute.xlu0 %2535  ;;  %1920 = vmatprep.subr.msk.bf16.mxu0 %vm3369_vm11, %v1918_v60 }
 0x173   : > { %v2538_v33 = vunpack.i.h.bf16 %v2536_v29  ;;  %v2537_v4 = vunpack.i.l.bf16 %v2536_v29  ;;  %v1318_v2 = vsel %vm1286_vm3, %v1285_v18, %v2543_v3  ;;  %v1317_v39 = vsel %vm1286_vm3, %v1284_v28, %v2542_v46 }
 0x174   : > { %v2551_v6 = vpop.permute.xlu1 %2550 }
 0x175   : > { %v1497_v50 = vsel %vm1484_vm9, %v1464_v11, %v2537_v4  ;;  %v1498_v63 = vsel %vm1484_vm9, %v1465_v54, %v2538_v33  ;;  %v2553_v22 = vunpack.i.h.bf16 %v2551_v6  ;;  %v2552_v43 = vunpack.i.l.bf16 %v2551_v6 }
 0x176   : > { %v1921_v52 = vpack.c.bf16 %v1498_v63, %v1497_v50  ;;  %v2546_v30 = vpop.permute.xlu0 %2545 }
 0x177   : > { %v2548_v15 = vunpack.i.h.bf16 %v2546_v30  ;;  %v2547_v58 = vunpack.i.l.bf16 %v2546_v30  ;;  %v1335_v34 = vsel %vm1319_vm4, %v1302_v19, %v2553_v22  ;;  %v1334_v57 = vsel %vm1319_vm4, %v1301_v62, %v2552_v43  ;;  %v1703_v19 = vld [vmem:[%s191_s9] sm:$0xff] }
 0x178   : > { %1923 = vmatpush3.bf16.xpose.msk.msra.mxu0 %vm3369_vm11, %v1921_v52  ;;  %v2561_v53 = vpop.permute.xlu1 %2560 }
 0x179   : > { %v2563_v45 = vunpack.i.h.bf16 %v2561_v53  ;;  %v2562_v21 = vunpack.i.l.bf16 %v2561_v53  ;;  %v1351_v51 = vsel %vm1319_vm4, %v1318_v2, %v2548_v15  ;;  %v1350_v60 = vsel %vm1319_vm4, %v1317_v39, %v2547_v58 }
 0x17a   : > { %v2556_v35 = vpop.permute.xlu0 %2555 }
 0x17b   : > { %v2558_v47 = vunpack.i.h.bf16 %v2556_v35  ;;  %v2557_v17 = vunpack.i.l.bf16 %v2556_v35  ;;  %v1367_v59 = vsel %vm1352_vm5, %v1334_v57, %v2562_v21  ;;  %v1368_v14 = vsel %vm1352_vm5, %v1335_v34, %v2563_v45 }
 0x17c   : > { %v2571_v40 = vpop.permute.xlu1 %2570 }
 0x17d   : > { %v2573_v5 = vunpack.i.h.bf16 %v2571_v40  ;;  %v2572_v10 = vunpack.i.l.bf16 %v2571_v40  ;;  %v1383_v11 = vsel %vm1352_vm5, %v1350_v60, %v2557_v17  ;;  %v1384_v54 = vsel %vm1352_vm5, %v1351_v51, %v2558_v47 }
 0x17e   : > { %v2566_v32 = vpop.permute.xlu0 %2565 }
 0x17f   : > { %v2568_v36 = vunpack.i.h.bf16 %v2566_v32  ;;  %v2567_v61 = vunpack.i.l.bf16 %v2566_v32  ;;  %v1400_v6 = vsel %vm1385_vm6, %v1367_v59, %v2572_v10  ;;  %v1401_v50 = vsel %vm1385_vm6, %v1368_v14, %v2573_v5 }
 0x180   : > { %v2581_v31 = vpop.permute.xlu1 %2580 }
 0x181   : > { %v2583_v12 = vunpack.i.h.bf16 %v2581_v31  ;;  %v2582_v16 = vunpack.i.l.bf16 %v2581_v31  ;;  %v1416_v63 = vsel %vm1385_vm6, %v1383_v11, %v2567_v61  ;;  %v1417_v52 = vsel %vm1385_vm6, %v1384_v54, %v2568_v36 }
 0x182   : > { %v2576_v24 = vpop.permute.xlu0 %2575 }
 0x183   : > { %v2578_v29 = vunpack.i.h.bf16 %v2576_v24  ;;  %v2577_v48 = vunpack.i.l.bf16 %v2576_v24  ;;  %v1433_v38 = vsel %vm1418_vm7, %v1400_v6, %v2582_v16  ;;  %v1434_v23 = vsel %vm1418_vm7, %v1401_v50, %v2583_v12 }
 0x184   : > { %v2591_v13 = vpop.permute.xlu1 %2590 }
 0x185   : > { %v2593_v26 = vunpack.i.h.bf16 %v2591_v13  ;;  %v2592_v33 = vunpack.i.l.bf16 %v2591_v13  ;;  %v1449_v56 = vsel %vm1418_vm7, %v1416_v63, %v2577_v48  ;;  %v1450_v44 = vsel %vm1418_vm7, %v1417_v52, %v2578_v29 }
 0x186   : > { %v2586_v4 = vpop.permute.xlu0 %2585 }
 0x187   : > { %v2588_v30 = vunpack.i.h.bf16 %v2586_v4  ;;  %v2587_v53 = vunpack.i.l.bf16 %v2586_v4  ;;  %v1466_v40 = vsel %vm1451_vm8, %v1433_v38, %v2592_v33  ;;  %v1467_v27 = vsel %vm1451_vm8, %v1434_v23, %v2593_v26 }
 0x188   : > { %v2601_v35 = vpop.permute.xlu1 %2600 }
 0x189   : > { %v2603_v55 = vunpack.i.h.bf16 %v2601_v35  ;;  %v2602_v42 = vunpack.i.l.bf16 %v2601_v35  ;;  %v1482_v43 = vsel %vm1451_vm8, %v1449_v56, %v2587_v53  ;;  %v1483_v32 = vsel %vm1451_vm8, %v1450_v44, %v2588_v30 }
 0x18a   : > { %v2596_v37 = vpop.permute.xlu0 %2595 }
 0x18b   : > { %v1499_v7 = vsel %vm1484_vm9, %v1466_v40, %v2602_v42  ;;  %v1500_v3 = vsel %vm1484_vm9, %v1467_v27, %v2603_v55  ;;  %v2598_v46 = vunpack.i.h.bf16 %v2596_v37  ;;  %v2597_v22 = vunpack.i.l.bf16 %v2596_v37 }
 0x18c   : > { %v1927_v0 = vpack.c.bf16 %v1500_v3, %v1499_v7 }
 0x18d   : > { %v1515_v9 = vsel %vm1484_vm9, %v1482_v43, %v2597_v22  ;;  %v1516_v8 = vsel %vm1484_vm9, %v1483_v32, %v2598_v46 }
 0x18e   : > { %v1924_v25 = vpack.c.bf16 %v1516_v8, %v1515_v9 }
 0x190   : > { %1926 = vmatprep.subr.msk.bf16.mxu0 %vm3369_vm11, %v1924_v25 }
 0x191   : > { %1929 = vmatpush3.bf16.xpose.msk.msra.mxu0 %vm3369_vm11, %v1927_v0 }
 0x198   : > { %1881 = vmatmul.mubr.msk.f32.vlgmr.msra.gmra.mrb[0].mxu0 %vm1518_vm10, %v3616_v41 }
 0x26b   : > { %v1684_v18 = vpop.f32.mrb[0].mxu0 }
 0x26c   : > { %v1704_v20 = vmul.f32 %v1684_v18, %v1684_v18  ;;  %v1686_v28 = vpop.f32.mrb[1].mxu0 }
 0x26d   : > { %v1697_v15 = vadd.f32 %v1686_v28, %v1684_v18  ;;  %v1705_v58 = vmul.f32 %v1686_v28, %v1686_v28 }
 0x26f   : > { %v1706_v31 = vadd.f32 %v1705_v58, %v1704_v20  ;;  %1698 = vadd.xlane.f32.xlu0 %v1697_v15 }
 0x271   : > { %1707 = vadd.xlane.f32.xlu1 %v1706_v31 }
 0x2fc   : > { %v1699_v41 = vpop.xlane.xlu0 %1698 }
 0x2fd   : > { %v1700_v62 = vadd.f32 %v1699_v41, %v1696_v1 }
 0x2fe   : > { %v1708_v45 = vpop.xlane.xlu1 %1707 }
 0x2ff   : > { %1702 = vst.msk [vmem:[%s187_s6] sm:$0xff] %vm1693_vm12, %v1700_v62  ;;  %v1709_v21 = vadd.f32 %v1708_v45, %v1703_v19 }
 0x301   : > { %1710 = vst.msk [vmem:[%s191_s9] sm:$0xff] %vm1693_vm12, %v1709_v21 }
 0x302 PF: > { %s14_s14 = sadd.s32 1, %s2656_s14   ;;  %s3975_s12 = smov %s2652_s13 }
 0x303   : > { %p11_p5 = scmp.ge.s32.totalorder %s14_s14, 4   ;;  %s3976_s13 = smov %s3978_s15 }
 0x305   :  { %13 = sbr.rel (!%p11_p5) target bundleno = 2 (0x2), region = 75 }

</bundles_post_ra>
